<compile_context>
chip_gen: v5e
topology: v5e:2x2
jax: 0.10.0
libtpu: 0.0.40
codegen_flags: <defaults>
</compile_context>

<pallas_src>
import numpy as np
import jax
import jax.numpy as jnp
from jax.experimental import pallas as pl
from jax.experimental.pallas import tpu as pltpu

# ----- small config consistent with MambaTrajEncoder.__init__ ----------------
TSTEP_DIM = 8
D_MODEL   = 32
D_STATE   = 8
D_CONV    = 4
EXPAND    = 2
N_LAYERS  = 2
D_INNER   = EXPAND * D_MODEL
DT_RANK   = -(-D_MODEL // 16)          # ceil(d_model / 16), mamba "auto" dt_rank
EPS       = 1e-5                       # LayerNorm eps


# ----- fused kernel -----------------------------------------------------------
def _fused_mamba_kernel(seq_ref, win_ref, binp_ref,
                        tsp_ref, red_ref, smask_ref, lsp_ref, avg_ref, shifts_ref,
                        lng_ref, lnb_ref, wx_ref, cw_ref, cb_ref,
                        wdbc_ref, dtb_ref, af_ref, dp_ref,
                        wout_ref, outg_ref, outb_ref, o_ref):
    L = seq_ref.shape[1]
    lanes = af_ref.shape[-1]                 # BB * D_INNER  (128 when BB=2)
    n_layers = lng_ref.shape[0]

    def mm(a, b):
        # bf16 MXU inputs (weights/constants are pre-cast host-side; activations cast
        # here), f32 accumulation -> single-pass MXU instead of the 3-pass f32 decomposition.
        return jnp.dot(a.astype(jnp.bfloat16), b.astype(jnp.bfloat16),
                       preferred_element_type=jnp.float32)

    def silu(v):
        return v * jax.nn.sigmoid(v)

    avg = avg_ref[...]                       # (BB*D_MODEL, BB*D_MODEL) block-averaging matrix

    def seg_ln(v, g, b):
        # batch-segmented LayerNorm over each 32-lane d_model block (via avg matmul)
        mu = mm(v, avg)
        var = mm((v - mu) ** 2, avg)
        return (v - mu) * jax.lax.rsqrt(var + EPS) * g + b

    tsp = tsp_ref[...]                       # (L*D_STATE, L)          time -> scan-row spread
    red = red_ref[...]                       # (L, L*D_STATE)          scan-row -> time reduce
    smask = smask_ref[...]                   # (L*D_STATE, 2*BB*D_STATE)  state selector (B|C)
    lsp = lsp_ref[...]                       # (2*BB*D_STATE, 2*lanes)    batch -> lane spread
    shifts = shifts_ref[...]                 # ((D_CONV-1)*L, L)       stacked causal shifts

    # input Linear (tstep_dim -> d_model), both packed batch elements at once
    x = mm(seq_ref[0], win_ref[...]) + binp_ref[...]              # (L, BB*D_MODEL)

    for layer in range(n_layers):                                 # static unroll, N_LAYERS=2
        xn = seg_ln(x, lng_ref[layer], lnb_ref[layer])

        # in_proj u|z halves in ONE matmul; split at lane-128 (vreg-granular, free)
        ur = mm(xn, wx_ref[layer])                                # (L, 2*lanes)
        u, res = ur[:, :lanes], ur[:, lanes:]

        # causal depthwise conv: one stacked shift matmul + per-tap FMAs
        cw = cw_ref[layer]                                        # (D_CONV, lanes)
        sh = mm(shifts, u)                                        # ((D_CONV-1)*L, lanes)
        uc = cw[D_CONV - 1:D_CONV, :] * u                         # shift-0 (identity) tap
        for s in range(1, D_CONV):
            uc = uc + cw[D_CONV - 1 - s:D_CONV - s, :] * sh[(s - 1) * L:s * L, :]
        u = silu(uc + cb_ref[layer])                              # (L, lanes)

        # fused (dt | B | C) projection; x_proj(dt)@dt_proj folded host-side
        dbc = mm(u, wdbc_ref[layer])                              # (L, lanes + 2*BB*D_STATE)
        delta = jax.nn.softplus(dbc[:, :lanes] + dtb_ref[layer])  # (L, lanes)
        bc = dbc[:, lanes:]                                       # (L, 2*BB*D_STATE)

        # spread every per-timestep scan operand to (L*D_STATE, .) rows with ONE tsp matmul
        sp = mm(tsp, jnp.concatenate([delta, delta * u, bc], axis=1))
        delta_sp = sp[:, :lanes]                                  # delta[b,t,c] per (s,c) row
        deltau_sp = sp[:, lanes:2 * lanes]                        # (delta*u)[b,t,c]
        bc_sp = sp[:, 2 * lanes:]                                 # B|C[b,t,s] columns

        # B / C lane spreads in one matmul; split at the lane-128 boundary (free)
        bcl = mm(bc_sp * smask, lsp)                              # (L*D_STATE, 2*lanes)
        bsp, csp = bcl[:, :lanes], bcl[:, lanes:]

        dA = jnp.exp(af_ref[layer] * delta_sp)                    # exp(A[s,c] * delta[b,t,c])
        dBu = bsp * deltau_sp                                     # B[b,t,s] * delta * u

        # Serial selective scan: each step is just one aligned (8,128) vreg FMA; the
        # cross-state reduce is deferred to a single MXU matmul after the loop (no XLU work).
        # TODO(synk): move slabs to VMEM scratch + lax.fori_loop if L / D_STATE ever grow.
        h = jnp.zeros((D_STATE, lanes), jnp.float32)
        hs = []
        for t in range(L):                                        # static unroll, L=8
            lo = t * D_STATE
            h = dA[lo:lo + D_STATE, :] * h + dBu[lo:lo + D_STATE, :]
            hs.append(h)
        H = jnp.concatenate(hs, axis=0)                           # (L*D_STATE, lanes), vregs
        y = mm(red, H * csp)                                      # (L, lanes)

        y = (y + u * dp_ref[layer]) * silu(res)                   # + u*D, then gate
        x = x + mm(y, wout_ref[layer])                            # out_proj + residual

    o_ref[0] = seg_ln(x, outg_ref[...], outb_ref[...]).astype(o_ref.dtype)


# ----- one-time host-side (numpy) packing --------------------------------------
def _np_block_diag(w, bb):
    w = np.asarray(w, np.float32)
    p, q = w.shape
    out = np.zeros((bb * p, bb * q), np.float32)
    for b in range(bb):
        out[b * p:(b + 1) * p, b * q:(b + 1) * q] = w
    return out


def _np_lane_tile(w, bb):
    return np.tile(np.asarray(w, np.float32), (1, bb))


def _scan_constants(L, bb):
    ld = L * D_STATE
    dst = bb * D_STATE
    lanes = bb * D_INNER
    # time -> scan-row spread (row r = t*D_STATE + s picks time t)
    tsp = np.zeros((ld, L), np.float32)
    tsp[np.arange(ld), np.arange(ld) // D_STATE] = 1.0
    red = np.ascontiguousarray(tsp.T)                       # scan-row -> time reduce
    # state selector over combined (B | C) columns
    smask = (np.arange(ld)[:, None] % D_STATE
             == np.arange(2 * dst)[None, :] % D_STATE).astype(np.float32)
    # (B | C) column -> lane spread: B part to lanes [0, lanes), C part to [lanes, 2*lanes)
    lsp = np.zeros((2 * dst, 2 * lanes), np.float32)
    for j in range(2 * dst):
        part = j // dst
        b = (j % dst) // D_STATE
        lsp[j, part * lanes + b * D_INNER: part * lanes + (b + 1) * D_INNER] = 1.0
    # per-d_model-block averaging matrix (1/32 is exact in bf16)
    avg = np.kron(np.eye(bb, dtype=np.float32),
                  np.full((D_MODEL, D_MODEL), 1.0 / D_MODEL, np.float32))
    # stacked causal shift matrices for taps 1..D_CONV-1
    shifts = np.zeros(((D_CONV - 1) * L, L), np.float32)
    for s in range(1, D_CONV):
        if s < L:
            shifts[(s - 1) * L + s: s * L, :L - s] = np.eye(L - s, dtype=np.float32)
    return tsp, red, smask, lsp, avg, shifts


def prepare_params(inp_w, inp_b, layers, outg, outb, L, batch_size):
    """Pack all weights/constants ONCE (pure numpy, host-side).  Call outside jit."""
    bb = 2 if batch_size % 2 == 0 else 1   # TODO(synk): bb=1 odd-batch fallback is untested
    f32 = lambda a: np.asarray(a, np.float32)

    tsp, red, smask, lsp, avg, shifts = _scan_constants(L, bb)

    keys = ("lng", "lnb", "wx", "cw", "cb", "wdbc", "dtb", "af", "dp", "wout")
    lists = {k: [] for k in keys}
    for (lng, lnb, inw, convw, convb, xpw, dtw, dtb, a_t, dparam, outw) in layers:
        (lng, lnb, inw, convw, convb, xpw, dtw, dtb, a_t, dparam, outw) = map(
            f32, (lng, lnb, inw, convw, convb, xpw, dtw, dtb, a_t, dparam, outw))
        lists["lng"].append(_np_lane_tile(lng, bb))
        lists["lnb"].append(_np_lane_tile(lnb, bb))
        # in_proj u|z halves as block-diagonal weights, fused into one matmul weight
        lists["wx"].append(np.concatenate(
            [_np_block_diag(inw[:, :D_INNER], bb),
             _np_block_diag(inw[:, D_INNER:], bb)], axis=1))
        lists["cw"].append(_np_lane_tile(convw, bb))
        lists["cb"].append(_np_lane_tile(convb, bb))
        # x_proj(dt) @ dt_proj fused host-side (f32 summation order differs slightly
        # from the reference); merged with the B / C projections into one weight
        wdl = _np_block_diag(xpw[:, :DT_RANK] @ dtw, bb)
        wb = _np_block_diag(xpw[:, DT_RANK:DT_RANK + D_STATE], bb)
        wc = _np_block_diag(xpw[:, DT_RANK + D_STATE:], bb)
        lists["wdbc"].append(np.concatenate([wdl, wb, wc], axis=1))
        lists["dtb"].append(_np_lane_tile(dtb, bb))
        lists["af"].append(np.tile(a_t, (L, bb)))            # A[s,c] per (t, b)
        lists["dp"].append(_np_lane_tile(dparam, bb))
        lists["wout"].append(_np_block_diag(outw, bb))
    st = {k: np.stack(v, axis=0) for k, v in lists.items()}

    bf = jnp.bfloat16
    dev = lambda a, dt=jnp.float32: jnp.asarray(a, dtype=dt)
    return {
        # constants (one-hot / 1/32 entries are exact in bf16)
        "tsp": dev(tsp, bf), "red": dev(red, bf), "smask": dev(smask),
        "lsp": dev(lsp, bf), "avg": dev(avg, bf), "shifts": dev(shifts, bf),
        # input Linear + out norm
        "win": dev(_np_block_diag(inp_w, bb), bf),
        "binp": dev(_np_lane_tile(inp_b, bb)),
        "outg": dev(_np_lane_tile(outg, bb)),
        "outb": dev(_np_lane_tile(outb, bb)),
        # per-layer stacks: matmul weights bf16, elementwise params f32
        "lng": dev(st["lng"]), "lnb": dev(st["lnb"]),
        "wx": dev(st["wx"], bf), "cw": dev(st["cw"]), "cb": dev(st["cb"]),
        "wdbc": dev(st["wdbc"], bf), "dtb": dev(st["dtb"]),
        "af": dev(st["af"]), "dp": dev(st["dp"]),
        "wout": dev(st["wout"], bf),
    }


# ----- wrapper ------------------------------------------------------------------
def mamba_traj_encoder_forward(seq, params):
    B, L, F = seq.shape
    lanes = params["af"].shape[-1]
    bb = lanes // D_INNER
    nb = B // bb

    # (B, L, F) -> (NB, L, BB*F): time on sublanes, batch*feature on lanes
    seq_p = seq.reshape(nb, bb, L, F).transpose(0, 2, 1, 3).reshape(nb, L, bb * F)

    names = ("win", "binp", "tsp", "red", "smask", "lsp", "avg", "shifts",
             "lng", "lnb", "wx", "cw", "cb", "wdbc", "dtb", "af", "dp",
             "wout", "outg", "outb")
    weights = tuple(params[n] for n in names)

    def rep(a):
        nd = a.ndim
        return pl.BlockSpec(a.shape, lambda i, _nd=nd: (0,) * _nd)

    in_specs = [pl.BlockSpec((1, L, bb * F), lambda i: (i, 0, 0))]
    in_specs += [rep(a) for a in weights]

    out_p = pl.pallas_call(
        _fused_mamba_kernel,
        out_shape=jax.ShapeDtypeStruct((nb, L, bb * D_MODEL), seq.dtype),
        grid=(nb,),
        in_specs=in_specs,
        out_specs=pl.BlockSpec((1, L, bb * D_MODEL), lambda i: (i, 0, 0)),
        compiler_params=pltpu.CompilerParams(dimension_semantics=("parallel",)),
    )(seq_p, *weights)

    # (NB, L, BB*D_MODEL) -> (B, L, D_MODEL)
    return out_p.reshape(nb, L, bb, D_MODEL).transpose(0, 2, 1, 3).reshape(B, L, D_MODEL)


# ----- deterministic parameter init (shapes from the module __init__) ---------
def init_params(key):
    keys = iter(jax.random.split(key, 4 + 8 * N_LAYERS))

    def nrm(shape, scale=0.05):
        return (scale * jax.random.normal(next(keys), shape)).astype(jnp.float32)

    inp_w = nrm((TSTEP_DIM, D_MODEL))
    inp_b = jnp.zeros((1, D_MODEL), jnp.float32)
    layers = []
    for _ in range(N_LAYERS):
        lng = jnp.ones((1, D_MODEL), jnp.float32)
        lnb = jnp.zeros((1, D_MODEL), jnp.float32)
        inw = nrm((D_MODEL, 2 * D_INNER))                     # in_proj (bias=False)
        convw = nrm((D_CONV, D_INNER), 0.2)                   # depthwise conv weight
        convb = jnp.zeros((1, D_INNER), jnp.float32)
        xpw = nrm((D_INNER, DT_RANK + 2 * D_STATE))           # x_proj (bias=False)
        dtw = nrm((DT_RANK, D_INNER), 0.5)                    # dt_proj
        dtb = jnp.log(jnp.expm1(jnp.full((1, D_INNER), 1e-2, jnp.float32)))
        A = jnp.tile(jnp.arange(1, D_STATE + 1, dtype=jnp.float32)[None, :],
                     (D_INNER, 1))                            # S4D-real init
        a_t = (-A).T                                          # A = -exp(A_log), (d_state, d_inner)
        dparam = jnp.ones((1, D_INNER), jnp.float32)
        outw = nrm((D_INNER, D_MODEL))                        # out_proj (bias=False)
        layers.append((lng, lnb, inw, convw, convb, xpw, dtw, dtb, a_t, dparam, outw))
    outg = jnp.ones((1, D_MODEL), jnp.float32)
    outb = jnp.zeros((1, D_MODEL), jnp.float32)
    return inp_w, inp_b, layers, outg, outb


# ----- pure-JAX reference (mirrors torch semantics, f32) ------------------------
def _ref_forward(seq, inp_w, inp_b, layers, outg, outb):
    def ln(x, g, b):
        mu = x.mean(-1, keepdims=True)
        var = ((x - mu) ** 2).mean(-1, keepdims=True)
        return (x - mu) / jnp.sqrt(var + EPS) * g + b

    def silu(x):
        return x * jax.nn.sigmoid(x)

    x = seq @ inp_w + inp_b
    Bsz, L, _ = x.shape
    for (lng, lnb, inw, convw, convb, xpw, dtw, dtb, a_t, dparam, outw) in layers:
        xn = ln(x, lng, lnb)
        xr = xn @ inw
        u, res = xr[..., :D_INNER], xr[..., D_INNER:]
        up = jnp.pad(u, ((0, 0), (D_CONV - 1, 0), (0, 0)))
        uc = sum(convw[k] * up[:, k:k + L, :] for k in range(D_CONV))
        u = silu(uc + convb)
        x_dbl = u @ xpw
        dt = x_dbl[..., :DT_RANK]
        Bm = x_dbl[..., DT_RANK:DT_RANK + D_STATE]
        Cm = x_dbl[..., DT_RANK + D_STATE:]
        delta = jax.nn.softplus(dt @ dtw + dtb)
        A = a_t.T                                             # (d_inner, d_state)
        h = jnp.zeros((Bsz, D_INNER, D_STATE))
        ys = []
        for t in range(L):
            dA = jnp.exp(delta[:, t, :, None] * A[None])
            dBu = delta[:, t, :, None] * Bm[:, t, None, :] * u[:, t, :, None]
            h = dA * h + dBu
            ys.append(jnp.sum(h * Cm[:, t, None, :], axis=-1))
        y = jnp.stack(ys, axis=1) + u * dparam
        y = y * silu(res)
        x = x + y @ outw
    return ln(x, outg, outb)


# ----- main --------------------------------------------------------------------
if __name__ == "__main__":
    B, L = 2, 8
    key = jax.random.PRNGKey(0)
    kx, kp = jax.random.split(key)
    seq = jax.random.normal(kx, (B, L, TSTEP_DIM), dtype=jnp.float32)
    inp_w, inp_b, layers, outg, outb = init_params(kp)

    # one-time host-side packing (NOT re-run per forward call)
    params = prepare_params(inp_w, inp_b, layers, outg, outb, L=L, batch_size=B)

    fwd = jax.jit(mamba_traj_encoder_forward)
    out = jax.block_until_ready(fwd(seq, params))

    assert out.shape == (B, L, D_MODEL)
    assert bool(jnp.all(jnp.isfinite(out)))
    ref = _ref_forward(seq, inp_w, inp_b, layers, outg, outb)
    np.testing.assert_allclose(np.asarray(out), np.asarray(ref), rtol=5e-2, atol=5e-2)
    print("KERNEL_OK")
</pallas_src>

<mosaic_0001>
module attributes {stable_mosaic.version = 11 : i64} {
  func.func @_fused_mamba_kernel(%arg0: i32, %arg1: memref<1x8x16xf32, #tpu.memory_space<vmem>>, %arg2: memref<16x64xbf16, #tpu.memory_space<vmem>>, %arg3: memref<1x64xf32, #tpu.memory_space<vmem>>, %arg4: memref<64x8xbf16, #tpu.memory_space<vmem>>, %arg5: memref<8x64xbf16, #tpu.memory_space<vmem>>, %arg6: memref<64x32xf32, #tpu.memory_space<vmem>>, %arg7: memref<32x256xbf16, #tpu.memory_space<vmem>>, %arg8: memref<64x64xbf16, #tpu.memory_space<vmem>>, %arg9: memref<24x8xbf16, #tpu.memory_space<vmem>>, %arg10: memref<2x1x64xf32, #tpu.memory_space<vmem>>, %arg11: memref<2x1x64xf32, #tpu.memory_space<vmem>>, %arg12: memref<2x64x256xbf16, #tpu.memory_space<vmem>>, %arg13: memref<2x4x128xf32, #tpu.memory_space<vmem>>, %arg14: memref<2x1x128xf32, #tpu.memory_space<vmem>>, %arg15: memref<2x128x160xbf16, #tpu.memory_space<vmem>>, %arg16: memref<2x1x128xf32, #tpu.memory_space<vmem>>, %arg17: memref<2x64x128xf32, #tpu.memory_space<vmem>>, %arg18: memref<2x1x128xf32, #tpu.memory_space<vmem>>, %arg19: memref<2x128x64xbf16, #tpu.memory_space<vmem>>, %arg20: memref<1x64xf32, #tpu.memory_space<vmem>>, %arg21: memref<1x64xf32, #tpu.memory_space<vmem>>, %arg22: memref<1x8x64xf32, #tpu.memory_space<vmem>>) attributes {dimension_semantics = [#tpu.dimension_semantics<parallel>], iteration_bounds = array<i64: 1>, scalar_prefetch = 0 : i64, scratch_operands = 0 : i64, tpu.core_type = #tpu.core_type<tc>, window_params = [{transform_indices = @transform_0, window_bounds = array<i64: 1, 8, 16>}, {pipeline_mode = #tpu.pipeline_mode<synchronous>, transform_indices = @transform_1, window_bounds = array<i64: 16, 64>}, {pipeline_mode = #tpu.pipeline_mode<synchronous>, transform_indices = @transform_2, window_bounds = array<i64: 1, 64>}, {pipeline_mode = #tpu.pipeline_mode<synchronous>, transform_indices = @transform_3, window_bounds = array<i64: 64, 8>}, {pipeline_mode = #tpu.pipeline_mode<synchronous>, transform_indices = @transform_4, window_bounds = array<i64: 8, 64>}, {pipeline_mode = #tpu.pipeline_mode<synchronous>, transform_indices = @transform_5, window_bounds = array<i64: 64, 32>}, {pipeline_mode = #tpu.pipeline_mode<synchronous>, transform_indices = @transform_6, window_bounds = array<i64: 32, 256>}, {pipeline_mode = #tpu.pipeline_mode<synchronous>, transform_indices = @transform_7, window_bounds = array<i64: 64, 64>}, {pipeline_mode = #tpu.pipeline_mode<synchronous>, transform_indices = @transform_8, window_bounds = array<i64: 24, 8>}, {pipeline_mode = #tpu.pipeline_mode<synchronous>, transform_indices = @transform_9, window_bounds = array<i64: 2, 1, 64>}, {pipeline_mode = #tpu.pipeline_mode<synchronous>, transform_indices = @transform_10, window_bounds = array<i64: 2, 1, 64>}, {pipeline_mode = #tpu.pipeline_mode<synchronous>, transform_indices = @transform_11, window_bounds = array<i64: 2, 64, 256>}, {pipeline_mode = #tpu.pipeline_mode<synchronous>, transform_indices = @transform_12, window_bounds = array<i64: 2, 4, 128>}, {pipeline_mode = #tpu.pipeline_mode<synchronous>, transform_indices = @transform_13, window_bounds = array<i64: 2, 1, 128>}, {pipeline_mode = #tpu.pipeline_mode<synchronous>, transform_indices = @transform_14, window_bounds = array<i64: 2, 128, 160>}, {pipeline_mode = #tpu.pipeline_mode<synchronous>, transform_indices = @transform_15, window_bounds = array<i64: 2, 1, 128>}, {pipeline_mode = #tpu.pipeline_mode<synchronous>, transform_indices = @transform_16, window_bounds = array<i64: 2, 64, 128>}, {pipeline_mode = #tpu.pipeline_mode<synchronous>, transform_indices = @transform_17, window_bounds = array<i64: 2, 1, 128>}, {pipeline_mode = #tpu.pipeline_mode<synchronous>, transform_indices = @transform_18, window_bounds = array<i64: 2, 128, 64>}, {pipeline_mode = #tpu.pipeline_mode<synchronous>, transform_indices = @transform_19, window_bounds = array<i64: 1, 64>}, {pipeline_mode = #tpu.pipeline_mode<synchronous>, transform_indices = @transform_20, window_bounds = array<i64: 1, 64>}, {transform_indices = @transform_21, window_bounds = array<i64: 1, 8, 64>}]} {
    %c0 = arith.constant 0 : index
    %c0_0 = arith.constant 0 : index
    %0 = vector.load %arg8[%c0, %c0_0] : memref<64x64xbf16, #tpu.memory_space<vmem>>, vector<64x64xbf16>
    %c0_1 = arith.constant 0 : index
    %c0_2 = arith.constant 0 : index
    %1 = vector.load %arg4[%c0_1, %c0_2] : memref<64x8xbf16, #tpu.memory_space<vmem>>, vector<64x8xbf16>
    %c0_3 = arith.constant 0 : index
    %c0_4 = arith.constant 0 : index
    %2 = vector.load %arg5[%c0_3, %c0_4] : memref<8x64xbf16, #tpu.memory_space<vmem>>, vector<8x64xbf16>
    %c0_5 = arith.constant 0 : index
    %c0_6 = arith.constant 0 : index
    %3 = vector.load %arg6[%c0_5, %c0_6] : memref<64x32xf32, #tpu.memory_space<vmem>>, vector<64x32xf32>
    %c0_7 = arith.constant 0 : index
    %c0_8 = arith.constant 0 : index
    %4 = vector.load %arg7[%c0_7, %c0_8] : memref<32x256xbf16, #tpu.memory_space<vmem>>, vector<32x256xbf16>
    %c0_9 = arith.constant 0 : index
    %c0_10 = arith.constant 0 : index
    %5 = vector.load %arg9[%c0_9, %c0_10] : memref<24x8xbf16, #tpu.memory_space<vmem>>, vector<24x8xbf16>
    %c0_11 = arith.constant 0 : index
    %c0_12 = arith.constant 0 : index
    %c0_13 = arith.constant 0 : index
    %6 = vector.load %arg1[%c0_11, %c0_12, %c0_13] : memref<1x8x16xf32, #tpu.memory_space<vmem>>, vector<1x8x16xf32>
    %7 = vector.shape_cast %6 : vector<1x8x16xf32> to vector<8x16xf32>
    %c0_14 = arith.constant 0 : index
    %c0_15 = arith.constant 0 : index
    %8 = vector.load %arg2[%c0_14, %c0_15] : memref<16x64xbf16, #tpu.memory_space<vmem>>, vector<16x64xbf16>
    %9 = arith.truncf %7 : vector<8x16xf32> to vector<8x16xbf16>
    %cst = arith.constant dense<0.000000e+00> : vector<8x64xf32>
    %10 = tpu.matmul %9, %8, %cst {dimension_numbers = #tpu.dot_dimension_numbers<[1], [0], [0], [1], [0, 0, 1, 1], [], []>} : vector<8x16xbf16>, vector<16x64xbf16>, vector<8x64xf32> -> vector<8x64xf32>
    %c0_16 = arith.constant 0 : index
    %c0_17 = arith.constant 0 : index
    %11 = vector.load %arg3[%c0_16, %c0_17] : memref<1x64xf32, #tpu.memory_space<vmem>>, vector<1x64xf32>
    %12 = vector.broadcast %11 : vector<1x64xf32> to vector<8x64xf32>
    %13 = arith.addf %10, %12 : vector<8x64xf32>
    %c0_18 = arith.constant 0 : index
    %c0_19 = arith.constant 0 : index
    %c0_20 = arith.constant 0 : index
    %14 = vector.load %arg10[%c0_18, %c0_19, %c0_20] : memref<2x1x64xf32, #tpu.memory_space<vmem>>, vector<1x1x64xf32>
    %15 = vector.shape_cast %14 : vector<1x1x64xf32> to vector<1x64xf32>
    %c0_21 = arith.constant 0 : index
    %c0_22 = arith.constant 0 : index
    %c0_23 = arith.constant 0 : index
    %16 = vector.load %arg11[%c0_21, %c0_22, %c0_23] : memref<2x1x64xf32, #tpu.memory_space<vmem>>, vector<1x1x64xf32>
    %17 = vector.shape_cast %16 : vector<1x1x64xf32> to vector<1x64xf32>
    %18 = arith.truncf %13 : vector<8x64xf32> to vector<8x64xbf16>
    %cst_24 = arith.constant dense<0.000000e+00> : vector<8x64xf32>
    %19 = tpu.matmul %18, %0, %cst_24 {dimension_numbers = #tpu.dot_dimension_numbers<[1], [0], [0], [1], [0, 0, 1, 1], [], []>} : vector<8x64xbf16>, vector<64x64xbf16>, vector<8x64xf32> -> vector<8x64xf32>
    %20 = arith.subf %13, %19 : vector<8x64xf32>
    %21 = arith.mulf %20, %20 : vector<8x64xf32>
    %22 = arith.truncf %21 : vector<8x64xf32> to vector<8x64xbf16>
    %cst_25 = arith.constant dense<0.000000e+00> : vector<8x64xf32>
    %23 = tpu.matmul %22, %0, %cst_25 {dimension_numbers = #tpu.dot_dimension_numbers<[1], [0], [0], [1], [0, 0, 1, 1], [], []>} : vector<8x64xbf16>, vector<64x64xbf16>, vector<8x64xf32> -> vector<8x64xf32>
    %24 = arith.subf %13, %19 : vector<8x64xf32>
    %cst_26 = arith.constant 9.99999974E-6 : f32
    %25 = vector.broadcast %cst_26 : f32 to vector<8x64xf32>
    %26 = arith.addf %23, %25 : vector<8x64xf32>
    %27 = math.rsqrt %26 : vector<8x64xf32>
    %28 = arith.mulf %24, %27 : vector<8x64xf32>
    %29 = vector.broadcast %15 : vector<1x64xf32> to vector<8x64xf32>
    %30 = arith.mulf %28, %29 : vector<8x64xf32>
    %31 = vector.broadcast %17 : vector<1x64xf32> to vector<8x64xf32>
    %32 = arith.addf %30, %31 : vector<8x64xf32>
    %c0_27 = arith.constant 0 : index
    %c0_28 = arith.constant 0 : index
    %c0_29 = arith.constant 0 : index
    %33 = vector.load %arg12[%c0_27, %c0_28, %c0_29] : memref<2x64x256xbf16, #tpu.memory_space<vmem>>, vector<1x64x256xbf16>
    %34 = vector.shape_cast %33 : vector<1x64x256xbf16> to vector<64x256xbf16>
    %35 = arith.truncf %32 : vector<8x64xf32> to vector<8x64xbf16>
    %cst_30 = arith.constant dense<0.000000e+00> : vector<8x256xf32>
    %36 = tpu.matmul %35, %34, %cst_30 {dimension_numbers = #tpu.dot_dimension_numbers<[1], [0], [0], [1], [0, 0, 1, 1], [], []>} : vector<8x64xbf16>, vector<64x256xbf16>, vector<8x256xf32> -> vector<8x256xf32>
    %37 = vector.extract_strided_slice %36 {offsets = [0, 0], sizes = [8, 128], strides = [1, 1]} : vector<8x256xf32> to vector<8x128xf32>
    %38 = vector.extract_strided_slice %36 {offsets = [0, 128], sizes = [8, 128], strides = [1, 1]} : vector<8x256xf32> to vector<8x128xf32>
    %c0_31 = arith.constant 0 : index
    %c0_32 = arith.constant 0 : index
    %c0_33 = arith.constant 0 : index
    %39 = vector.load %arg13[%c0_31, %c0_32, %c0_33] : memref<2x4x128xf32, #tpu.memory_space<vmem>>, vector<1x4x128xf32>
    %40 = vector.shape_cast %39 : vector<1x4x128xf32> to vector<4x128xf32>
    %41 = arith.truncf %37 : vector<8x128xf32> to vector<8x128xbf16>
    %cst_34 = arith.constant dense<0.000000e+00> : vector<24x128xf32>
    %42 = tpu.matmul %5, %41, %cst_34 {dimension_numbers = #tpu.dot_dimension_numbers<[1], [0], [0], [1], [0, 0, 1, 1], [], []>} : vector<24x8xbf16>, vector<8x128xbf16>, vector<24x128xf32> -> vector<24x128xf32>
    %43 = vector.extract_strided_slice %40 {offsets = [3, 0], sizes = [1, 128], strides = [1, 1]} : vector<4x128xf32> to vector<1x128xf32>
    %44 = vector.broadcast %43 : vector<1x128xf32> to vector<8x128xf32>
    %45 = arith.mulf %44, %37 : vector<8x128xf32>
    %46 = vector.extract_strided_slice %40 {offsets = [2, 0], sizes = [1, 128], strides = [1, 1]} : vector<4x128xf32> to vector<1x128xf32>
    %47 = vector.extract_strided_slice %42 {offsets = [0, 0], sizes = [8, 128], strides = [1, 1]} : vector<24x128xf32> to vector<8x128xf32>
    %48 = vector.broadcast %46 : vector<1x128xf32> to vector<8x128xf32>
    %49 = arith.mulf %48, %47 : vector<8x128xf32>
    %50 = arith.addf %45, %49 : vector<8x128xf32>
    %51 = vector.extract_strided_slice %40 {offsets = [1, 0], sizes = [1, 128], strides = [1, 1]} : vector<4x128xf32> to vector<1x128xf32>
    %52 = vector.extract_strided_slice %42 {offsets = [8, 0], sizes = [8, 128], strides = [1, 1]} : vector<24x128xf32> to vector<8x128xf32>
    %53 = vector.broadcast %51 : vector<1x128xf32> to vector<8x128xf32>
    %54 = arith.mulf %53, %52 : vector<8x128xf32>
    %55 = arith.addf %50, %54 : vector<8x128xf32>
    %56 = vector.extract_strided_slice %40 {offsets = [0, 0], sizes = [1, 128], strides = [1, 1]} : vector<4x128xf32> to vector<1x128xf32>
    %57 = vector.extract_strided_slice %42 {offsets = [16, 0], sizes = [8, 128], strides = [1, 1]} : vector<24x128xf32> to vector<8x128xf32>
    %58 = vector.broadcast %56 : vector<1x128xf32> to vector<8x128xf32>
    %59 = arith.mulf %58, %57 : vector<8x128xf32>
    %60 = arith.addf %55, %59 : vector<8x128xf32>
    %c0_35 = arith.constant 0 : index
    %c0_36 = arith.constant 0 : index
    %c0_37 = arith.constant 0 : index
    %61 = vector.load %arg14[%c0_35, %c0_36, %c0_37] : memref<2x1x128xf32, #tpu.memory_space<vmem>>, vector<1x1x128xf32>
    %62 = vector.shape_cast %61 : vector<1x1x128xf32> to vector<1x128xf32>
    %63 = vector.broadcast %62 : vector<1x128xf32> to vector<8x128xf32>
    %64 = arith.addf %60, %63 : vector<8x128xf32>
    %65 = arith.negf %64 : vector<8x128xf32>
    %66 = math.exp %65 : vector<8x128xf32>
    %cst_38 = arith.constant 1.000000e+00 : f32
    %67 = vector.broadcast %cst_38 : f32 to vector<8x128xf32>
    %68 = arith.addf %67, %66 : vector<8x128xf32>
    %69 = arith.divf %67, %68 : vector<8x128xf32>
    %70 = arith.mulf %64, %69 : vector<8x128xf32>
    %c0_39 = arith.constant 0 : index
    %c0_40 = arith.constant 0 : index
    %c0_41 = arith.constant 0 : index
    %71 = vector.load %arg15[%c0_39, %c0_40, %c0_41] : memref<2x128x160xbf16, #tpu.memory_space<vmem>>, vector<1x128x160xbf16>
    %72 = vector.shape_cast %71 : vector<1x128x160xbf16> to vector<128x160xbf16>
    %73 = arith.truncf %70 : vector<8x128xf32> to vector<8x128xbf16>
    %cst_42 = arith.constant dense<0.000000e+00> : vector<8x160xf32>
    %74 = tpu.matmul %73, %72, %cst_42 {dimension_numbers = #tpu.dot_dimension_numbers<[1], [0], [0], [1], [0, 0, 1, 1], [], []>} : vector<8x128xbf16>, vector<128x160xbf16>, vector<8x160xf32> -> vector<8x160xf32>
    %75 = vector.extract_strided_slice %74 {offsets = [0, 0], sizes = [8, 128], strides = [1, 1]} : vector<8x160xf32> to vector<8x128xf32>
    %c0_43 = arith.constant 0 : index
    %c0_44 = arith.constant 0 : index
    %c0_45 = arith.constant 0 : index
    %76 = vector.load %arg16[%c0_43, %c0_44, %c0_45] : memref<2x1x128xf32, #tpu.memory_space<vmem>>, vector<1x1x128xf32>
    %77 = vector.shape_cast %76 : vector<1x1x128xf32> to vector<1x128xf32>
    %78 = vector.broadcast %77 : vector<1x128xf32> to vector<8x128xf32>
    %79 = arith.addf %75, %78 : vector<8x128xf32>
    %cst_46 = arith.constant 0.000000e+00 : f32
    %80 = vector.broadcast %cst_46 : f32 to vector<8x128xf32>
    %81 = arith.maximumf %79, %80 : vector<8x128xf32>
    %82 = vector.broadcast %cst_46 : f32 to vector<8x128xf32>
    %83 = arith.subf %79, %82 : vector<8x128xf32>
    %84 = arith.cmpf one, %83, %83 : vector<8x128xf32>
    %85 = vector.broadcast %cst_46 : f32 to vector<8x128xf32>
    %86 = arith.addf %79, %85 : vector<8x128xf32>
    %87 = math.absf %83 : vector<8x128xf32>
    %cst_47 = arith.constant 0.000000e+00 : f32
    %88 = vector.broadcast %cst_47 : f32 to vector<8x128xf32>
    %89 = arith.subf %88, %87 : vector<8x128xf32>
    %90 = math.exp %89 : vector<8x128xf32>
    %91 = math.log1p %90 : vector<8x128xf32>
    %92 = arith.addf %81, %91 : vector<8x128xf32>
    %93 = arith.select %84, %86, %92 : vector<8x128xi1>, vector<8x128xf32>
    %94 = vector.extract_strided_slice %74 {offsets = [0, 128], sizes = [8, 32], strides = [1, 1]} : vector<8x160xf32> to vector<8x32xf32>
    %95 = arith.mulf %93, %70 : vector<8x128xf32>
    %96 = tpu.concatenate %93, %95, %94 in 1 : vector<8x128xf32>, vector<8x128xf32>, vector<8x32xf32> -> vector<8x288xf32>
    %97 = arith.truncf %96 : vector<8x288xf32> to vector<8x288xbf16>
    %cst_48 = arith.constant dense<0.000000e+00> : vector<64x288xf32>
    %98 = tpu.matmul %1, %97, %cst_48 {dimension_numbers = #tpu.dot_dimension_numbers<[1], [0], [0], [1], [0, 0, 1, 1], [], []>} : vector<64x8xbf16>, vector<8x288xbf16>, vector<64x288xf32> -> vector<64x288xf32>
    %99 = vector.extract_strided_slice %98 {offsets = [0, 0], sizes = [64, 128], strides = [1, 1]} : vector<64x288xf32> to vector<64x128xf32>
    %100 = vector.extract_strided_slice %98 {offsets = [0, 128], sizes = [64, 128], strides = [1, 1]} : vector<64x288xf32> to vector<64x128xf32>
    %101 = vector.extract_strided_slice %98 {offsets = [0, 256], sizes = [64, 32], strides = [1, 1]} : vector<64x288xf32> to vector<64x32xf32>
    %102 = arith.mulf %101, %3 : vector<64x32xf32>
    %103 = arith.truncf %102 : vector<64x32xf32> to vector<64x32xbf16>
    %cst_49 = arith.constant dense<0.000000e+00> : vector<64x256xf32>
    %104 = tpu.matmul %103, %4, %cst_49 {dimension_numbers = #tpu.dot_dimension_numbers<[1], [0], [0], [1], [0, 0, 1, 1], [], []>} : vector<64x32xbf16>, vector<32x256xbf16>, vector<64x256xf32> -> vector<64x256xf32>
    %105 = vector.extract_strided_slice %104 {offsets = [0, 0], sizes = [64, 128], strides = [1, 1]} : vector<64x256xf32> to vector<64x128xf32>
    %106 = vector.extract_strided_slice %104 {offsets = [0, 128], sizes = [64, 128], strides = [1, 1]} : vector<64x256xf32> to vector<64x128xf32>
    %c0_50 = arith.constant 0 : index
    %c0_51 = arith.constant 0 : index
    %c0_52 = arith.constant 0 : index
    %107 = vector.load %arg17[%c0_50, %c0_51, %c0_52] : memref<2x64x128xf32, #tpu.memory_space<vmem>>, vector<1x64x128xf32>
    %108 = vector.shape_cast %107 : vector<1x64x128xf32> to vector<64x128xf32>
    %109 = arith.mulf %108, %99 : vector<64x128xf32>
    %110 = math.exp %109 : vector<64x128xf32>
    %111 = arith.mulf %105, %100 : vector<64x128xf32>
    %cst_53 = arith.constant 0.000000e+00 : f32
    %112 = vector.broadcast %cst_53 : f32 to vector<8x128xf32>
    %113 = vector.extract_strided_slice %110 {offsets = [0, 0], sizes = [8, 128], strides = [1, 1]} : vector<64x128xf32> to vector<8x128xf32>
    %114 = arith.mulf %113, %112 : vector<8x128xf32>
    %115 = vector.extract_strided_slice %111 {offsets = [0, 0], sizes = [8, 128], strides = [1, 1]} : vector<64x128xf32> to vector<8x128xf32>
    %116 = arith.addf %114, %115 : vector<8x128xf32>
    %117 = vector.extract_strided_slice %110 {offsets = [8, 0], sizes = [8, 128], strides = [1, 1]} : vector<64x128xf32> to vector<8x128xf32>
    %118 = arith.mulf %117, %116 : vector<8x128xf32>
    %119 = vector.extract_strided_slice %111 {offsets = [8, 0], sizes = [8, 128], strides = [1, 1]} : vector<64x128xf32> to vector<8x128xf32>
    %120 = arith.addf %118, %119 : vector<8x128xf32>
    %121 = vector.extract_strided_slice %110 {offsets = [16, 0], sizes = [8, 128], strides = [1, 1]} : vector<64x128xf32> to vector<8x128xf32>
    %122 = arith.mulf %121, %120 : vector<8x128xf32>
    %123 = vector.extract_strided_slice %111 {offsets = [16, 0], sizes = [8, 128], strides = [1, 1]} : vector<64x128xf32> to vector<8x128xf32>
    %124 = arith.addf %122, %123 : vector<8x128xf32>
    %125 = vector.extract_strided_slice %110 {offsets = [24, 0], sizes = [8, 128], strides = [1, 1]} : vector<64x128xf32> to vector<8x128xf32>
    %126 = arith.mulf %125, %124 : vector<8x128xf32>
    %127 = vector.extract_strided_slice %111 {offsets = [24, 0], sizes = [8, 128], strides = [1, 1]} : vector<64x128xf32> to vector<8x128xf32>
    %128 = arith.addf %126, %127 : vector<8x128xf32>
    %129 = vector.extract_strided_slice %110 {offsets = [32, 0], sizes = [8, 128], strides = [1, 1]} : vector<64x128xf32> to vector<8x128xf32>
    %130 = arith.mulf %129, %128 : vector<8x128xf32>
    %131 = vector.extract_strided_slice %111 {offsets = [32, 0], sizes = [8, 128], strides = [1, 1]} : vector<64x128xf32> to vector<8x128xf32>
    %132 = arith.addf %130, %131 : vector<8x128xf32>
    %133 = vector.extract_strided_slice %110 {offsets = [40, 0], sizes = [8, 128], strides = [1, 1]} : vector<64x128xf32> to vector<8x128xf32>
    %134 = arith.mulf %133, %132 : vector<8x128xf32>
    %135 = vector.extract_strided_slice %111 {offsets = [40, 0], sizes = [8, 128], strides = [1, 1]} : vector<64x128xf32> to vector<8x128xf32>
    %136 = arith.addf %134, %135 : vector<8x128xf32>
    %137 = vector.extract_strided_slice %110 {offsets = [48, 0], sizes = [8, 128], strides = [1, 1]} : vector<64x128xf32> to vector<8x128xf32>
    %138 = arith.mulf %137, %136 : vector<8x128xf32>
    %139 = vector.extract_strided_slice %111 {offsets = [48, 0], sizes = [8, 128], strides = [1, 1]} : vector<64x128xf32> to vector<8x128xf32>
    %140 = arith.addf %138, %139 : vector<8x128xf32>
    %141 = vector.extract_strided_slice %110 {offsets = [56, 0], sizes = [8, 128], strides = [1, 1]} : vector<64x128xf32> to vector<8x128xf32>
    %142 = arith.mulf %141, %140 : vector<8x128xf32>
    %143 = vector.extract_strided_slice %111 {offsets = [56, 0], sizes = [8, 128], strides = [1, 1]} : vector<64x128xf32> to vector<8x128xf32>
    %144 = arith.addf %142, %143 : vector<8x128xf32>
    %145 = tpu.concatenate %116, %120, %124, %128, %132, %136, %140, %144 in 0 : vector<8x128xf32>, vector<8x128xf32>, vector<8x128xf32>, vector<8x128xf32>, vector<8x128xf32>, vector<8x128xf32>, vector<8x128xf32>, vector<8x128xf32> -> vector<64x128xf32>
    %146 = arith.mulf %145, %106 : vector<64x128xf32>
    %147 = arith.truncf %146 : vector<64x128xf32> to vector<64x128xbf16>
    %cst_54 = arith.constant dense<0.000000e+00> : vector<8x128xf32>
    %148 = tpu.matmul %2, %147, %cst_54 {dimension_numbers = #tpu.dot_dimension_numbers<[1], [0], [0], [1], [0, 0, 1, 1], [], []>} : vector<8x64xbf16>, vector<64x128xbf16>, vector<8x128xf32> -> vector<8x128xf32>
    %c0_55 = arith.constant 0 : index
    %c0_56 = arith.constant 0 : index
    %c0_57 = arith.constant 0 : index
    %149 = vector.load %arg18[%c0_55, %c0_56, %c0_57] : memref<2x1x128xf32, #tpu.memory_space<vmem>>, vector<1x1x128xf32>
    %150 = vector.shape_cast %149 : vector<1x1x128xf32> to vector<1x128xf32>
    %151 = vector.broadcast %150 : vector<1x128xf32> to vector<8x128xf32>
    %152 = arith.mulf %70, %151 : vector<8x128xf32>
    %153 = arith.addf %148, %152 : vector<8x128xf32>
    %154 = arith.negf %38 : vector<8x128xf32>
    %155 = math.exp %154 : vector<8x128xf32>
    %cst_58 = arith.constant 1.000000e+00 : f32
    %156 = vector.broadcast %cst_58 : f32 to vector<8x128xf32>
    %157 = arith.addf %156, %155 : vector<8x128xf32>
    %158 = arith.divf %156, %157 : vector<8x128xf32>
    %159 = arith.mulf %38, %158 : vector<8x128xf32>
    %160 = arith.mulf %153, %159 : vector<8x128xf32>
    %c0_59 = arith.constant 0 : index
    %c0_60 = arith.constant 0 : index
    %c0_61 = arith.constant 0 : index
    %161 = vector.load %arg19[%c0_59, %c0_60, %c0_61] : memref<2x128x64xbf16, #tpu.memory_space<vmem>>, vector<1x128x64xbf16>
    %162 = vector.shape_cast %161 : vector<1x128x64xbf16> to vector<128x64xbf16>
    %163 = arith.truncf %160 : vector<8x128xf32> to vector<8x128xbf16>
    %cst_62 = arith.constant dense<0.000000e+00> : vector<8x64xf32>
    %164 = tpu.matmul %163, %162, %cst_62 {dimension_numbers = #tpu.dot_dimension_numbers<[1], [0], [0], [1], [0, 0, 1, 1], [], []>} : vector<8x128xbf16>, vector<128x64xbf16>, vector<8x64xf32> -> vector<8x64xf32>
    %165 = arith.addf %13, %164 : vector<8x64xf32>
    %c1 = arith.constant 1 : index
    %c0_63 = arith.constant 0 : index
    %c0_64 = arith.constant 0 : index
    %166 = vector.load %arg10[%c1, %c0_63, %c0_64] : memref<2x1x64xf32, #tpu.memory_space<vmem>>, vector<1x1x64xf32>
    %167 = vector.shape_cast %166 : vector<1x1x64xf32> to vector<1x64xf32>
    %c1_65 = arith.constant 1 : index
    %c0_66 = arith.constant 0 : index
    %c0_67 = arith.constant 0 : index
    %168 = vector.load %arg11[%c1_65, %c0_66, %c0_67] : memref<2x1x64xf32, #tpu.memory_space<vmem>>, vector<1x1x64xf32>
    %169 = vector.shape_cast %168 : vector<1x1x64xf32> to vector<1x64xf32>
    %170 = arith.truncf %165 : vector<8x64xf32> to vector<8x64xbf16>
    %cst_68 = arith.constant dense<0.000000e+00> : vector<8x64xf32>
    %171 = tpu.matmul %170, %0, %cst_68 {dimension_numbers = #tpu.dot_dimension_numbers<[1], [0], [0], [1], [0, 0, 1, 1], [], []>} : vector<8x64xbf16>, vector<64x64xbf16>, vector<8x64xf32> -> vector<8x64xf32>
    %172 = arith.subf %165, %171 : vector<8x64xf32>
    %173 = arith.mulf %172, %172 : vector<8x64xf32>
    %174 = arith.truncf %173 : vector<8x64xf32> to vector<8x64xbf16>
    %cst_69 = arith.constant dense<0.000000e+00> : vector<8x64xf32>
    %175 = tpu.matmul %174, %0, %cst_69 {dimension_numbers = #tpu.dot_dimension_numbers<[1], [0], [0], [1], [0, 0, 1, 1], [], []>} : vector<8x64xbf16>, vector<64x64xbf16>, vector<8x64xf32> -> vector<8x64xf32>
    %176 = arith.subf %165, %171 : vector<8x64xf32>
    %cst_70 = arith.constant 9.99999974E-6 : f32
    %177 = vector.broadcast %cst_70 : f32 to vector<8x64xf32>
    %178 = arith.addf %175, %177 : vector<8x64xf32>
    %179 = math.rsqrt %178 : vector<8x64xf32>
    %180 = arith.mulf %176, %179 : vector<8x64xf32>
    %181 = vector.broadcast %167 : vector<1x64xf32> to vector<8x64xf32>
    %182 = arith.mulf %180, %181 : vector<8x64xf32>
    %183 = vector.broadcast %169 : vector<1x64xf32> to vector<8x64xf32>
    %184 = arith.addf %182, %183 : vector<8x64xf32>
    %c1_71 = arith.constant 1 : index
    %c0_72 = arith.constant 0 : index
    %c0_73 = arith.constant 0 : index
    %185 = vector.load %arg12[%c1_71, %c0_72, %c0_73] : memref<2x64x256xbf16, #tpu.memory_space<vmem>>, vector<1x64x256xbf16>
    %186 = vector.shape_cast %185 : vector<1x64x256xbf16> to vector<64x256xbf16>
    %187 = arith.truncf %184 : vector<8x64xf32> to vector<8x64xbf16>
    %cst_74 = arith.constant dense<0.000000e+00> : vector<8x256xf32>
    %188 = tpu.matmul %187, %186, %cst_74 {dimension_numbers = #tpu.dot_dimension_numbers<[1], [0], [0], [1], [0, 0, 1, 1], [], []>} : vector<8x64xbf16>, vector<64x256xbf16>, vector<8x256xf32> -> vector<8x256xf32>
    %189 = vector.extract_strided_slice %188 {offsets = [0, 0], sizes = [8, 128], strides = [1, 1]} : vector<8x256xf32> to vector<8x128xf32>
    %190 = vector.extract_strided_slice %188 {offsets = [0, 128], sizes = [8, 128], strides = [1, 1]} : vector<8x256xf32> to vector<8x128xf32>
    %c1_75 = arith.constant 1 : index
    %c0_76 = arith.constant 0 : index
    %c0_77 = arith.constant 0 : index
    %191 = vector.load %arg13[%c1_75, %c0_76, %c0_77] : memref<2x4x128xf32, #tpu.memory_space<vmem>>, vector<1x4x128xf32>
    %192 = vector.shape_cast %191 : vector<1x4x128xf32> to vector<4x128xf32>
    %193 = arith.truncf %189 : vector<8x128xf32> to vector<8x128xbf16>
    %cst_78 = arith.constant dense<0.000000e+00> : vector<24x128xf32>
    %194 = tpu.matmul %5, %193, %cst_78 {dimension_numbers = #tpu.dot_dimension_numbers<[1], [0], [0], [1], [0, 0, 1, 1], [], []>} : vector<24x8xbf16>, vector<8x128xbf16>, vector<24x128xf32> -> vector<24x128xf32>
    %195 = vector.extract_strided_slice %192 {offsets = [3, 0], sizes = [1, 128], strides = [1, 1]} : vector<4x128xf32> to vector<1x128xf32>
    %196 = vector.broadcast %195 : vector<1x128xf32> to vector<8x128xf32>
    %197 = arith.mulf %196, %189 : vector<8x128xf32>
    %198 = vector.extract_strided_slice %192 {offsets = [2, 0], sizes = [1, 128], strides = [1, 1]} : vector<4x128xf32> to vector<1x128xf32>
    %199 = vector.extract_strided_slice %194 {offsets = [0, 0], sizes = [8, 128], strides = [1, 1]} : vector<24x128xf32> to vector<8x128xf32>
    %200 = vector.broadcast %198 : vector<1x128xf32> to vector<8x128xf32>
    %201 = arith.mulf %200, %199 : vector<8x128xf32>
    %202 = arith.addf %197, %201 : vector<8x128xf32>
    %203 = vector.extract_strided_slice %192 {offsets = [1, 0], sizes = [1, 128], strides = [1, 1]} : vector<4x128xf32> to vector<1x128xf32>
    %204 = vector.extract_strided_slice %194 {offsets = [8, 0], sizes = [8, 128], strides = [1, 1]} : vector<24x128xf32> to vector<8x128xf32>
    %205 = vector.broadcast %203 : vector<1x128xf32> to vector<8x128xf32>
    %206 = arith.mulf %205, %204 : vector<8x128xf32>
    %207 = arith.addf %202, %206 : vector<8x128xf32>
    %208 = vector.extract_strided_slice %192 {offsets = [0, 0], sizes = [1, 128], strides = [1, 1]} : vector<4x128xf32> to vector<1x128xf32>
    %209 = vector.extract_strided_slice %194 {offsets = [16, 0], sizes = [8, 128], strides = [1, 1]} : vector<24x128xf32> to vector<8x128xf32>
    %210 = vector.broadcast %208 : vector<1x128xf32> to vector<8x128xf32>
    %211 = arith.mulf %210, %209 : vector<8x128xf32>
    %212 = arith.addf %207, %211 : vector<8x128xf32>
    %c1_79 = arith.constant 1 : index
    %c0_80 = arith.constant 0 : index
    %c0_81 = arith.constant 0 : index
    %213 = vector.load %arg14[%c1_79, %c0_80, %c0_81] : memref<2x1x128xf32, #tpu.memory_space<vmem>>, vector<1x1x128xf32>
    %214 = vector.shape_cast %213 : vector<1x1x128xf32> to vector<1x128xf32>
    %215 = vector.broadcast %214 : vector<1x128xf32> to vector<8x128xf32>
    %216 = arith.addf %212, %215 : vector<8x128xf32>
    %217 = arith.negf %216 : vector<8x128xf32>
    %218 = math.exp %217 : vector<8x128xf32>
    %cst_82 = arith.constant 1.000000e+00 : f32
    %219 = vector.broadcast %cst_82 : f32 to vector<8x128xf32>
    %220 = arith.addf %219, %218 : vector<8x128xf32>
    %221 = arith.divf %219, %220 : vector<8x128xf32>
    %222 = arith.mulf %216, %221 : vector<8x128xf32>
    %c1_83 = arith.constant 1 : index
    %c0_84 = arith.constant 0 : index
    %c0_85 = arith.constant 0 : index
    %223 = vector.load %arg15[%c1_83, %c0_84, %c0_85] : memref<2x128x160xbf16, #tpu.memory_space<vmem>>, vector<1x128x160xbf16>
    %224 = vector.shape_cast %223 : vector<1x128x160xbf16> to vector<128x160xbf16>
    %225 = arith.truncf %222 : vector<8x128xf32> to vector<8x128xbf16>
    %cst_86 = arith.constant dense<0.000000e+00> : vector<8x160xf32>
    %226 = tpu.matmul %225, %224, %cst_86 {dimension_numbers = #tpu.dot_dimension_numbers<[1], [0], [0], [1], [0, 0, 1, 1], [], []>} : vector<8x128xbf16>, vector<128x160xbf16>, vector<8x160xf32> -> vector<8x160xf32>
    %227 = vector.extract_strided_slice %226 {offsets = [0, 0], sizes = [8, 128], strides = [1, 1]} : vector<8x160xf32> to vector<8x128xf32>
    %c1_87 = arith.constant 1 : index
    %c0_88 = arith.constant 0 : index
    %c0_89 = arith.constant 0 : index
    %228 = vector.load %arg16[%c1_87, %c0_88, %c0_89] : memref<2x1x128xf32, #tpu.memory_space<vmem>>, vector<1x1x128xf32>
    %229 = vector.shape_cast %228 : vector<1x1x128xf32> to vector<1x128xf32>
    %230 = vector.broadcast %229 : vector<1x128xf32> to vector<8x128xf32>
    %231 = arith.addf %227, %230 : vector<8x128xf32>
    %cst_90 = arith.constant 0.000000e+00 : f32
    %232 = vector.broadcast %cst_90 : f32 to vector<8x128xf32>
    %233 = arith.maximumf %231, %232 : vector<8x128xf32>
    %234 = vector.broadcast %cst_90 : f32 to vector<8x128xf32>
    %235 = arith.subf %231, %234 : vector<8x128xf32>
    %236 = arith.cmpf one, %235, %235 : vector<8x128xf32>
    %237 = vector.broadcast %cst_90 : f32 to vector<8x128xf32>
    %238 = arith.addf %231, %237 : vector<8x128xf32>
    %239 = math.absf %235 : vector<8x128xf32>
    %cst_91 = arith.constant 0.000000e+00 : f32
    %240 = vector.broadcast %cst_91 : f32 to vector<8x128xf32>
    %241 = arith.subf %240, %239 : vector<8x128xf32>
    %242 = math.exp %241 : vector<8x128xf32>
    %243 = math.log1p %242 : vector<8x128xf32>
    %244 = arith.addf %233, %243 : vector<8x128xf32>
    %245 = arith.select %236, %238, %244 : vector<8x128xi1>, vector<8x128xf32>
    %246 = vector.extract_strided_slice %226 {offsets = [0, 128], sizes = [8, 32], strides = [1, 1]} : vector<8x160xf32> to vector<8x32xf32>
    %247 = arith.mulf %245, %222 : vector<8x128xf32>
    %248 = tpu.concatenate %245, %247, %246 in 1 : vector<8x128xf32>, vector<8x128xf32>, vector<8x32xf32> -> vector<8x288xf32>
    %249 = arith.truncf %248 : vector<8x288xf32> to vector<8x288xbf16>
    %cst_92 = arith.constant dense<0.000000e+00> : vector<64x288xf32>
    %250 = tpu.matmul %1, %249, %cst_92 {dimension_numbers = #tpu.dot_dimension_numbers<[1], [0], [0], [1], [0, 0, 1, 1], [], []>} : vector<64x8xbf16>, vector<8x288xbf16>, vector<64x288xf32> -> vector<64x288xf32>
    %251 = vector.extract_strided_slice %250 {offsets = [0, 0], sizes = [64, 128], strides = [1, 1]} : vector<64x288xf32> to vector<64x128xf32>
    %252 = vector.extract_strided_slice %250 {offsets = [0, 128], sizes = [64, 128], strides = [1, 1]} : vector<64x288xf32> to vector<64x128xf32>
    %253 = vector.extract_strided_slice %250 {offsets = [0, 256], sizes = [64, 32], strides = [1, 1]} : vector<64x288xf32> to vector<64x32xf32>
    %254 = arith.mulf %253, %3 : vector<64x32xf32>
    %255 = arith.truncf %254 : vector<64x32xf32> to vector<64x32xbf16>
    %cst_93 = arith.constant dense<0.000000e+00> : vector<64x256xf32>
    %256 = tpu.matmul %255, %4, %cst_93 {dimension_numbers = #tpu.dot_dimension_numbers<[1], [0], [0], [1], [0, 0, 1, 1], [], []>} : vector<64x32xbf16>, vector<32x256xbf16>, vector<64x256xf32> -> vector<64x256xf32>
    %257 = vector.extract_strided_slice %256 {offsets = [0, 0], sizes = [64, 128], strides = [1, 1]} : vector<64x256xf32> to vector<64x128xf32>
    %258 = vector.extract_strided_slice %256 {offsets = [0, 128], sizes = [64, 128], strides = [1, 1]} : vector<64x256xf32> to vector<64x128xf32>
    %c1_94 = arith.constant 1 : index
    %c0_95 = arith.constant 0 : index
    %c0_96 = arith.constant 0 : index
    %259 = vector.load %arg17[%c1_94, %c0_95, %c0_96] : memref<2x64x128xf32, #tpu.memory_space<vmem>>, vector<1x64x128xf32>
    %260 = vector.shape_cast %259 : vector<1x64x128xf32> to vector<64x128xf32>
    %261 = arith.mulf %260, %251 : vector<64x128xf32>
    %262 = math.exp %261 : vector<64x128xf32>
    %263 = arith.mulf %257, %252 : vector<64x128xf32>
    %cst_97 = arith.constant 0.000000e+00 : f32
    %264 = vector.broadcast %cst_97 : f32 to vector<8x128xf32>
    %265 = vector.extract_strided_slice %262 {offsets = [0, 0], sizes = [8, 128], strides = [1, 1]} : vector<64x128xf32> to vector<8x128xf32>
    %266 = arith.mulf %265, %264 : vector<8x128xf32>
    %267 = vector.extract_strided_slice %263 {offsets = [0, 0], sizes = [8, 128], strides = [1, 1]} : vector<64x128xf32> to vector<8x128xf32>
    %268 = arith.addf %266, %267 : vector<8x128xf32>
    %269 = vector.extract_strided_slice %262 {offsets = [8, 0], sizes = [8, 128], strides = [1, 1]} : vector<64x128xf32> to vector<8x128xf32>
    %270 = arith.mulf %269, %268 : vector<8x128xf32>
    %271 = vector.extract_strided_slice %263 {offsets = [8, 0], sizes = [8, 128], strides = [1, 1]} : vector<64x128xf32> to vector<8x128xf32>
    %272 = arith.addf %270, %271 : vector<8x128xf32>
    %273 = vector.extract_strided_slice %262 {offsets = [16, 0], sizes = [8, 128], strides = [1, 1]} : vector<64x128xf32> to vector<8x128xf32>
    %274 = arith.mulf %273, %272 : vector<8x128xf32>
    %275 = vector.extract_strided_slice %263 {offsets = [16, 0], sizes = [8, 128], strides = [1, 1]} : vector<64x128xf32> to vector<8x128xf32>
    %276 = arith.addf %274, %275 : vector<8x128xf32>
    %277 = vector.extract_strided_slice %262 {offsets = [24, 0], sizes = [8, 128], strides = [1, 1]} : vector<64x128xf32> to vector<8x128xf32>
    %278 = arith.mulf %277, %276 : vector<8x128xf32>
    %279 = vector.extract_strided_slice %263 {offsets = [24, 0], sizes = [8, 128], strides = [1, 1]} : vector<64x128xf32> to vector<8x128xf32>
    %280 = arith.addf %278, %279 : vector<8x128xf32>
    %281 = vector.extract_strided_slice %262 {offsets = [32, 0], sizes = [8, 128], strides = [1, 1]} : vector<64x128xf32> to vector<8x128xf32>
    %282 = arith.mulf %281, %280 : vector<8x128xf32>
    %283 = vector.extract_strided_slice %263 {offsets = [32, 0], sizes = [8, 128], strides = [1, 1]} : vector<64x128xf32> to vector<8x128xf32>
    %284 = arith.addf %282, %283 : vector<8x128xf32>
    %285 = vector.extract_strided_slice %262 {offsets = [40, 0], sizes = [8, 128], strides = [1, 1]} : vector<64x128xf32> to vector<8x128xf32>
    %286 = arith.mulf %285, %284 : vector<8x128xf32>
    %287 = vector.extract_strided_slice %263 {offsets = [40, 0], sizes = [8, 128], strides = [1, 1]} : vector<64x128xf32> to vector<8x128xf32>
    %288 = arith.addf %286, %287 : vector<8x128xf32>
    %289 = vector.extract_strided_slice %262 {offsets = [48, 0], sizes = [8, 128], strides = [1, 1]} : vector<64x128xf32> to vector<8x128xf32>
    %290 = arith.mulf %289, %288 : vector<8x128xf32>
    %291 = vector.extract_strided_slice %263 {offsets = [48, 0], sizes = [8, 128], strides = [1, 1]} : vector<64x128xf32> to vector<8x128xf32>
    %292 = arith.addf %290, %291 : vector<8x128xf32>
    %293 = vector.extract_strided_slice %262 {offsets = [56, 0], sizes = [8, 128], strides = [1, 1]} : vector<64x128xf32> to vector<8x128xf32>
    %294 = arith.mulf %293, %292 : vector<8x128xf32>
    %295 = vector.extract_strided_slice %263 {offsets = [56, 0], sizes = [8, 128], strides = [1, 1]} : vector<64x128xf32> to vector<8x128xf32>
    %296 = arith.addf %294, %295 : vector<8x128xf32>
    %297 = tpu.concatenate %268, %272, %276, %280, %284, %288, %292, %296 in 0 : vector<8x128xf32>, vector<8x128xf32>, vector<8x128xf32>, vector<8x128xf32>, vector<8x128xf32>, vector<8x128xf32>, vector<8x128xf32>, vector<8x128xf32> -> vector<64x128xf32>
    %298 = arith.mulf %297, %258 : vector<64x128xf32>
    %299 = arith.truncf %298 : vector<64x128xf32> to vector<64x128xbf16>
    %cst_98 = arith.constant dense<0.000000e+00> : vector<8x128xf32>
    %300 = tpu.matmul %2, %299, %cst_98 {dimension_numbers = #tpu.dot_dimension_numbers<[1], [0], [0], [1], [0, 0, 1, 1], [], []>} : vector<8x64xbf16>, vector<64x128xbf16>, vector<8x128xf32> -> vector<8x128xf32>
    %c1_99 = arith.constant 1 : index
    %c0_100 = arith.constant 0 : index
    %c0_101 = arith.constant 0 : index
    %301 = vector.load %arg18[%c1_99, %c0_100, %c0_101] : memref<2x1x128xf32, #tpu.memory_space<vmem>>, vector<1x1x128xf32>
    %302 = vector.shape_cast %301 : vector<1x1x128xf32> to vector<1x128xf32>
    %303 = vector.broadcast %302 : vector<1x128xf32> to vector<8x128xf32>
    %304 = arith.mulf %222, %303 : vector<8x128xf32>
    %305 = arith.addf %300, %304 : vector<8x128xf32>
    %306 = arith.negf %190 : vector<8x128xf32>
    %307 = math.exp %306 : vector<8x128xf32>
    %cst_102 = arith.constant 1.000000e+00 : f32
    %308 = vector.broadcast %cst_102 : f32 to vector<8x128xf32>
    %309 = arith.addf %308, %307 : vector<8x128xf32>
    %310 = arith.divf %308, %309 : vector<8x128xf32>
    %311 = arith.mulf %190, %310 : vector<8x128xf32>
    %312 = arith.mulf %305, %311 : vector<8x128xf32>
    %c1_103 = arith.constant 1 : index
    %c0_104 = arith.constant 0 : index
    %c0_105 = arith.constant 0 : index
    %313 = vector.load %arg19[%c1_103, %c0_104, %c0_105] : memref<2x128x64xbf16, #tpu.memory_space<vmem>>, vector<1x128x64xbf16>
    %314 = vector.shape_cast %313 : vector<1x128x64xbf16> to vector<128x64xbf16>
    %315 = arith.truncf %312 : vector<8x128xf32> to vector<8x128xbf16>
    %cst_106 = arith.constant dense<0.000000e+00> : vector<8x64xf32>
    %316 = tpu.matmul %315, %314, %cst_106 {dimension_numbers = #tpu.dot_dimension_numbers<[1], [0], [0], [1], [0, 0, 1, 1], [], []>} : vector<8x128xbf16>, vector<128x64xbf16>, vector<8x64xf32> -> vector<8x64xf32>
    %317 = arith.addf %165, %316 : vector<8x64xf32>
    %c0_107 = arith.constant 0 : index
    %c0_108 = arith.constant 0 : index
    %318 = vector.load %arg20[%c0_107, %c0_108] : memref<1x64xf32, #tpu.memory_space<vmem>>, vector<1x64xf32>
    %c0_109 = arith.constant 0 : index
    %c0_110 = arith.constant 0 : index
    %319 = vector.load %arg21[%c0_109, %c0_110] : memref<1x64xf32, #tpu.memory_space<vmem>>, vector<1x64xf32>
    %320 = arith.truncf %317 : vector<8x64xf32> to vector<8x64xbf16>
    %cst_111 = arith.constant dense<0.000000e+00> : vector<8x64xf32>
    %321 = tpu.matmul %320, %0, %cst_111 {dimension_numbers = #tpu.dot_dimension_numbers<[1], [0], [0], [1], [0, 0, 1, 1], [], []>} : vector<8x64xbf16>, vector<64x64xbf16>, vector<8x64xf32> -> vector<8x64xf32>
    %322 = arith.subf %317, %321 : vector<8x64xf32>
    %323 = arith.mulf %322, %322 : vector<8x64xf32>
    %324 = arith.truncf %323 : vector<8x64xf32> to vector<8x64xbf16>
    %cst_112 = arith.constant dense<0.000000e+00> : vector<8x64xf32>
    %325 = tpu.matmul %324, %0, %cst_112 {dimension_numbers = #tpu.dot_dimension_numbers<[1], [0], [0], [1], [0, 0, 1, 1], [], []>} : vector<8x64xbf16>, vector<64x64xbf16>, vector<8x64xf32> -> vector<8x64xf32>
    %326 = arith.subf %317, %321 : vector<8x64xf32>
    %cst_113 = arith.constant 9.99999974E-6 : f32
    %327 = vector.broadcast %cst_113 : f32 to vector<8x64xf32>
    %328 = arith.addf %325, %327 : vector<8x64xf32>
    %329 = math.rsqrt %328 : vector<8x64xf32>
    %330 = arith.mulf %326, %329 : vector<8x64xf32>
    %331 = vector.broadcast %318 : vector<1x64xf32> to vector<8x64xf32>
    %332 = arith.mulf %330, %331 : vector<8x64xf32>
    %333 = vector.broadcast %319 : vector<1x64xf32> to vector<8x64xf32>
    %334 = arith.addf %332, %333 : vector<8x64xf32>
    %c0_114 = arith.constant 0 : index
    %c0_115 = arith.constant 0 : index
    %c0_116 = arith.constant 0 : index
    %335 = vector.load %arg22[%c0_114, %c0_115, %c0_116] : memref<1x8x64xf32, #tpu.memory_space<vmem>>, vector<1x8x64xf32>
    %336 = vector.shape_cast %335 : vector<1x8x64xf32> to vector<8x64xf32>
    %337 = vector.shape_cast %334 : vector<8x64xf32> to vector<1x8x64xf32>
    tpu.vector_store %arg22[%c0_114, %c0_115, %c0_116], %337 {strides = array<i32>} : memref<1x8x64xf32, #tpu.memory_space<vmem>>, vector<1x8x64xf32>,
    return
  }
  func.func @transform_0(%arg0: i32) -> (i32, i32, i32) {
    %c0_i32 = arith.constant 0 : i32
    %c0_i32_0 = arith.constant 0 : i32
    %c0_i32_1 = arith.constant 0 : i32
    return %arg0, %c0_i32, %c0_i32_0 : i32, i32, i32
  }
  func.func @transform_1(%arg0: i32) -> (i32, i32) {
    %c0_i32 = arith.constant 0 : i32
    %c0_i32_0 = arith.constant 0 : i32
    %c0_i32_1 = arith.constant 0 : i32
    return %c0_i32, %c0_i32_0 : i32, i32
  }
  func.func @transform_2(%arg0: i32) -> (i32, i32) {
    %c0_i32 = arith.constant 0 : i32
    %c0_i32_0 = arith.constant 0 : i32
    %c0_i32_1 = arith.constant 0 : i32
    return %c0_i32, %c0_i32_0 : i32, i32
  }
  func.func @transform_3(%arg0: i32) -> (i32, i32) {
    %c0_i32 = arith.constant 0 : i32
    %c0_i32_0 = arith.constant 0 : i32
    %c0_i32_1 = arith.constant 0 : i32
    return %c0_i32, %c0_i32_0 : i32, i32
  }
  func.func @transform_4(%arg0: i32) -> (i32, i32) {
    %c0_i32 = arith.constant 0 : i32
    %c0_i32_0 = arith.constant 0 : i32
    %c0_i32_1 = arith.constant 0 : i32
    return %c0_i32, %c0_i32_0 : i32, i32
  }
  func.func @transform_5(%arg0: i32) -> (i32, i32) {
    %c0_i32 = arith.constant 0 : i32
    %c0_i32_0 = arith.constant 0 : i32
    %c0_i32_1 = arith.constant 0 : i32
    return %c0_i32, %c0_i32_0 : i32, i32
  }
  func.func @transform_6(%arg0: i32) -> (i32, i32) {
    %c0_i32 = arith.constant 0 : i32
    %c0_i32_0 = arith.constant 0 : i32
    %c0_i32_1 = arith.constant 0 : i32
    return %c0_i32, %c0_i32_0 : i32, i32
  }
  func.func @transform_7(%arg0: i32) -> (i32, i32) {
    %c0_i32 = arith.constant 0 : i32
    %c0_i32_0 = arith.constant 0 : i32
    %c0_i32_1 = arith.constant 0 : i32
    return %c0_i32, %c0_i32_0 : i32, i32
  }
  func.func @transform_8(%arg0: i32) -> (i32, i32) {
    %c0_i32 = arith.constant 0 : i32
    %c0_i32_0 = arith.constant 0 : i32
    %c0_i32_1 = arith.constant 0 : i32
    return %c0_i32, %c0_i32_0 : i32, i32
  }
  func.func @transform_9(%arg0: i32) -> (i32, i32, i32) {
    %c0_i32 = arith.constant 0 : i32
    %c0_i32_0 = arith.constant 0 : i32
    %c0_i32_1 = arith.constant 0 : i32
    %c0_i32_2 = arith.constant 0 : i32
    return %c0_i32, %c0_i32_0, %c0_i32_1 : i32, i32, i32
  }
  func.func @transform_10(%arg0: i32) -> (i32, i32, i32) {
    %c0_i32 = arith.constant 0 : i32
    %c0_i32_0 = arith.constant 0 : i32
    %c0_i32_1 = arith.constant 0 : i32
    %c0_i32_2 = arith.constant 0 : i32
    return %c0_i32, %c0_i32_0, %c0_i32_1 : i32, i32, i32
  }
  func.func @transform_11(%arg0: i32) -> (i32, i32, i32) {
    %c0_i32 = arith.constant 0 : i32
    %c0_i32_0 = arith.constant 0 : i32
    %c0_i32_1 = arith.constant 0 : i32
    %c0_i32_2 = arith.constant 0 : i32
    return %c0_i32, %c0_i32_0, %c0_i32_1 : i32, i32, i32
  }
  func.func @transform_12(%arg0: i32) -> (i32, i32, i32) {
    %c0_i32 = arith.constant 0 : i32
    %c0_i32_0 = arith.constant 0 : i32
    %c0_i32_1 = arith.constant 0 : i32
    %c0_i32_2 = arith.constant 0 : i32
    return %c0_i32, %c0_i32_0, %c0_i32_1 : i32, i32, i32
  }
  func.func @transform_13(%arg0: i32) -> (i32, i32, i32) {
    %c0_i32 = arith.constant 0 : i32
    %c0_i32_0 = arith.constant 0 : i32
    %c0_i32_1 = arith.constant 0 : i32
    %c0_i32_2 = arith.constant 0 : i32
    return %c0_i32, %c0_i32_0, %c0_i32_1 : i32, i32, i32
  }
  func.func @transform_14(%arg0: i32) -> (i32, i32, i32) {
    %c0_i32 = arith.constant 0 : i32
    %c0_i32_0 = arith.constant 0 : i32
    %c0_i32_1 = arith.constant 0 : i32
    %c0_i32_2 = arith.constant 0 : i32
    return %c0_i32, %c0_i32_0, %c0_i32_1 : i32, i32, i32
  }
  func.func @transform_15(%arg0: i32) -> (i32, i32, i32) {
    %c0_i32 = arith.constant 0 : i32
    %c0_i32_0 = arith.constant 0 : i32
    %c0_i32_1 = arith.constant 0 : i32
    %c0_i32_2 = arith.constant 0 : i32
    return %c0_i32, %c0_i32_0, %c0_i32_1 : i32, i32, i32
  }
  func.func @transform_16(%arg0: i32) -> (i32, i32, i32) {
    %c0_i32 = arith.constant 0 : i32
    %c0_i32_0 = arith.constant 0 : i32
    %c0_i32_1 = arith.constant 0 : i32
    %c0_i32_2 = arith.constant 0 : i32
    return %c0_i32, %c0_i32_0, %c0_i32_1 : i32, i32, i32
  }
  func.func @transform_17(%arg0: i32) -> (i32, i32, i32) {
    %c0_i32 = arith.constant 0 : i32
    %c0_i32_0 = arith.constant 0 : i32
    %c0_i32_1 = arith.constant 0 : i32
    %c0_i32_2 = arith.constant 0 : i32
    return %c0_i32, %c0_i32_0, %c0_i32_1 : i32, i32, i32
  }
  func.func @transform_18(%arg0: i32) -> (i32, i32, i32) {
    %c0_i32 = arith.constant 0 : i32
    %c0_i32_0 = arith.constant 0 : i32
    %c0_i32_1 = arith.constant 0 : i32
    %c0_i32_2 = arith.constant 0 : i32
    return %c0_i32, %c0_i32_0, %c0_i32_1 : i32, i32, i32
  }
  func.func @transform_19(%arg0: i32) -> (i32, i32) {
    %c0_i32 = arith.constant 0 : i32
    %c0_i32_0 = arith.constant 0 : i32
    %c0_i32_1 = arith.constant 0 : i32
    return %c0_i32, %c0_i32_0 : i32, i32
  }
  func.func @transform_20(%arg0: i32) -> (i32, i32) {
    %c0_i32 = arith.constant 0 : i32
    %c0_i32_0 = arith.constant 0 : i32
    %c0_i32_1 = arith.constant 0 : i32
    return %c0_i32, %c0_i32_0 : i32, i32
  }
  func.func @transform_21(%arg0: i32) -> (i32, i32, i32) {
    %c0_i32 = arith.constant 0 : i32
    %c0_i32_0 = arith.constant 0 : i32
    %c0_i32_1 = arith.constant 0 : i32
    return %arg0, %c0_i32, %c0_i32_0 : i32, i32, i32
  }
}

</mosaic_0001>

<bundles_post_ra>
// kernel: mamba_traj_encoder_forward.1
= control target key start
LH: loop header
LB: loop body
LE: loop exit
PB: predicated region body
PF: predicated region fallthrough
CT: control target
= control target key end

     0   :  { %vm115_vm0 = vcmask 130048   ;;  %vm159_vm1 = vcmask 523264   ;;  %vm309_vm5 = vcmask 1043456   ;;  %vm302_vm6 = vcmask 64512   ;;  %s3215_s1 = inlined_call_operand.vmem [shape: bf16[16,64], index: 1, kind: input, shape index: {}]   ;;  %s3216_s0 = inlined_call_operand.vmem [shape: f32[1,8,16], index: 0, kind: input, shape index: {}]   ;;  %s3217_s7 = inlined_call_operand.vmem [shape: bf16[64,64], index: 7, kind: input, shape index: {}]   ;;  %s3218_s2 = inlined_call_operand.vmem [shape: f32[1,64], index: 2, kind: input, shape index: {}]   ;;  %s3219_s9 = inlined_call_operand.vmem [shape: f32[2,1,64], index: 9, kind: input, shape index: {}]   ;;  %s3220_s10 = inlined_call_operand.vmem [shape: f32[2,1,64], index: 10, kind: input, shape index: {}]   ;;  %s3221_s11 = inlined_call_operand.vmem [shape: bf16[2,64,256], index: 11, kind: input, shape index: {}]   ;;  %s3222_s8 = inlined_call_operand.vmem [shape: bf16[24,8], index: 8, kind: input, shape index: {}]   ;;  %s3223_s13 = inlined_call_operand.vmem [shape: f32[2,1,128], index: 13, kind: input, shape index: {}]   ;;  %s3224_s17 = inlined_call_operand.vmem [shape: f32[2,1,128], index: 17, kind: input, shape index: {}]   ;;  %s3225_s15 = inlined_call_operand.vmem [shape: f32[2,1,128], index: 15, kind: input, shape index: {}]   ;;  %s3226_s14 = inlined_call_operand.vmem [shape: bf16[2,128,160], index: 14, kind: input, shape index: {}]   ;;  %s3227_s12 = inlined_call_operand.vmem [shape: f32[2,4,128], index: 12, kind: input, shape index: {}]   ;;  %s3228_s3 = inlined_call_operand.vmem [shape: bf16[64,8], index: 3, kind: input, shape index: {}]   ;;  %s3229_s6 = inlined_call_operand.vmem [shape: bf16[32,256], index: 6, kind: input, shape index: {}]   ;;  %s3230_s5 = inlined_call_operand.vmem [shape: f32[64,32], index: 5, kind: input, shape index: {}]   ;;  %s3231_s16 = inlined_call_operand.vmem [shape: f32[2,64,128], index: 16, kind: input, shape index: {}]   ;;  %s3232_s18 = inlined_call_operand.vmem [shape: bf16[2,128,64], index: 18, kind: input, shape index: {}]   ;;  %s3233_s4 = inlined_call_operand.vmem [shape: bf16[8,64], index: 4, kind: input, shape index: {}]   ;;  %s3234_s19 = inlined_call_operand.vmem [shape: f32[1,64], index: 19, kind: input, shape index: {}]   ;;  %s3235_s20 = inlined_call_operand.vmem [shape: f32[1,64], index: 20, kind: input, shape index: {}]   ;;  %s3236_s21 = inlined_call_operand.vmem [shape: f32[1,8,64], index: 21, kind: output, shape index: {}]  }
   0x1   :  { %3241 = sst [smem:[#allocation2_spill]] %s3215_s1  ;;  %v1766_v17 = vld [vmem:[%s3221_s11 + $0x30] sm:$0xf]  ;;  %v2165_v18 = vld [vmem:[%s3221_s11 + $0x34] sm:$0xf0]  ;;  %v2521_v62 = vld [vmem:[%s3222_s8] sm:$0xff] }
   0x2   :  { %3242 = sst [smem:[#allocation3_spill]] %s3216_s0  ;;  %v2164_v19 = vld [vmem:[%s3221_s11 + $0x34] sm:$0xf]  ;;  %v1767_v20 = vor.u32 %v2165_v18, %v1766_v17  ;;  %v1768_v21 = vld [vmem:[%s3221_s11 + $0x38] sm:$0xf0]  ;;  %vm677_vm13 = vcmask 261120  }
   0x3   :  { %3243 = sst [smem:[#allocation4_spill]] %s3217_s7  ;;  %v1771_v22 = vor.u32 %v2164_v19, %v1768_v21  ;;  %v1758_v23 = vld [vmem:[%s3221_s11 + $0x20] sm:$0xf]  ;;  %v2163_v24 = vld [vmem:[%s3221_s11 + $0x24] sm:$0xf0] }
   0x4   :  { %3244 = sst [smem:[#allocation5_spill]] %s3218_s2  ;;  %270 = vmatpush.bf16.msra.mxu3 %v1767_v20  ;;  %v2162_v25 = vld [vmem:[%s3221_s11 + $0x24] sm:$0xf]  ;;  %v1759_v26 = vor.u32 %v2163_v24, %v1758_v23  ;;  %v1760_v27 = vld [vmem:[%s3221_s11 + $0x28] sm:$0xf0] }
   0x5   :  { %3245 = sst [smem:[#allocation6_spill]] %s3219_s9  ;;  %v1763_v28 = vor.u32 %v2162_v25, %v1760_v27  ;;  %v1750_v29 = vld [vmem:[%s3221_s11 + $0x10] sm:$0xf]  ;;  %v2161_v30 = vld [vmem:[%s3221_s11 + $0x14] sm:$0xf0] }
   0x6   :  { %3246 = sst [smem:[#allocation7_spill]] %s3220_s10  ;;  %v2160_v31 = vld [vmem:[%s3221_s11 + $0x14] sm:$0xf]  ;;  %v1751_v32 = vor.u32 %v2161_v30, %v1750_v29  ;;  %v1752_v33 = vld [vmem:[%s3221_s11 + $0x18] sm:$0xf0] }
   0x7   :  { %3247 = sst [smem:[#allocation8_spill]] %s3224_s17  ;;  %v1742_v34 = vld [vmem:[%s3221_s11] sm:$0xf]  ;;  %v2159_v35 = vld [vmem:[%s3221_s11 + $0x4] sm:$0xf0]  ;;  %v1755_v36 = vor.u32 %v2160_v31, %v1752_v33 }
   0x8   :  { %s3248_s26 = sld [smem:[#allocation2_spill]]  ;;  %271 = vmatpush.bf16.msra.mxu3 %v1759_v26  ;;  %v2158_v37 = vld [vmem:[%s3221_s11 + $0x4] sm:$0xf]  ;;  %v1744_v38 = vld [vmem:[%s3221_s11 + $0x8] sm:$0xf0]  ;;  %v1743_v39 = vor.u32 %v2159_v35, %v1742_v34 }
   0x9   :  { %s3249_s17 = sld [smem:[#allocation3_spill]]  ;;  %v1747_v40 = vor.u32 %v2158_v37, %v1744_v38  ;;  %v1833_v18 = vld [vmem:[%s3226_s14 + $0x68] sm:$0xf0]  ;;  %v1823_v20 = vld [vmem:[%s3226_s14 + $0x50] sm:$0xf] }
   0xa   :  { %s3250_s1 = sld [smem:[#allocation4_spill]]  ;;  %v2177_v21 = vld [vmem:[%s3226_s14 + $0x54] sm:$0xf0]  ;;  %v1825_v24 = vld [vmem:[%s3226_s14 + $0x58] sm:$0xf0] }
   0xb   :  { %s3251_s7 = sld [smem:[#allocation5_spill]]  ;;  %v1824_v23 = vor.u32 %v2177_v21, %v1823_v20  ;;  %v1815_v27 = vld [vmem:[%s3226_s14 + $0x40] sm:$0xf]  ;;  %v2174_v29 = vld [vmem:[%s3226_s14 + $0x44] sm:$0xf] }
   0xc   :  { %272 = vmatpush.bf16.msra.mxu3 %v1751_v32  ;;  %s3252_s28 = sld [smem:[#allocation6_spill]]  ;;  %v1817_v31 = vld [vmem:[%s3226_s14 + $0x48] sm:$0xf0]  ;;  %v292_v33 = vld [vmem:[%s3227_s12] sm:$0xf] }
   0xd   :  { %s3253_s30 = sld [smem:[#allocation7_spill]]  ;;  %v1820_v32 = vor.u32 %v2174_v29, %v1817_v31  ;;  %v1807_v34 = vld [vmem:[%s3226_s14 + $0x30] sm:$0xf]  ;;  %v2173_v35 = vld [vmem:[%s3226_s14 + $0x34] sm:$0xf0] }
   0xe   :  { %v2157_v0 = vld [vmem:[%s3248_s26] sm:$0xff]  ;;  %v1808_v37 = vor.u32 %v2173_v35, %v1807_v34  ;;  %v1809_v38 = vld [vmem:[%s3226_s14 + $0x38] sm:$0xf0] }
   0xf   :  { %v101_v1 = vld [vmem:[%s3249_s17] sm:$0xff]  ;;  %126 = vmatpush.bf16.msra.mxu0 %v2157_v0  ;;  %v100_v0 = vld [vmem:[%s3222_s8 + $0x8] sm:$0xf] }
  0x10   :  { %v2420_v2 = vld [vmem:[%s3250_s1 + $0x18] sm:$0xff]  ;;  %v104_v3 = vpack.c.bf16 %v101_v1, %v101_v1  ;;  %v2426_v4 = vld [vmem:[%s3250_s1 + $0x10] sm:$0xff]  ;;  %v2433_v5 = vld [vmem:[%s3250_s1 + $0x8] sm:$0xff]  ;;  %273 = vmatpush.bf16.msra.mxu3 %v1743_v39  ;;  %v299_v1 = vunpack.c.l.b16 %v100_v0  ;;  %v333_v39 = vperm.slane %v292_v33, 2 }
  0x11   :  { %167 = vmatpush.bf16.msra.mxu1 %v2420_v2  ;;  %186 = vmatpush.bf16.msra.mxu2 %v2420_v2  ;;  %v2441_v6 = vld [vmem:[%s3250_s1] sm:$0xff] }
  0x12   :  { %1721 = vmatmul.msk.bf16.vlgmr.msra.gmra.mxu0 %vm115_vm0, %v104_v3  ;;  %v2222_v7 = vld [vmem:[%s3251_s7] ss:$0 sm:$0xff]  ;;  %v2528_v3 = vpack.c.b16 %v299_v1, %v299_v1 }
  0x13   :  { %283 = vmatpush.bf16.msrb.mxu0 %v1771_v22  ;;  %v2223_v50 = vld [vmem:[%s3252_s28] ss:$0 sm:$0xff]  ;;  %v2176_v22 = vld [vmem:[%s3226_s14 + $0x54] sm:$0xf] }
  0x14   :  { %v2224_v53 = vld [vmem:[%s3253_s30] ss:$0 sm:$0xff]  ;;  %v1828_v25 = vor.u32 %v2176_v22, %v1825_v24 }
  0x15   :  { %168 = vmatpush.bf16.msra.mxu1 %v2426_v4  ;;  %187 = vmatpush.bf16.msra.mxu2 %v2426_v4  ;;  %v2227_v0 = vld [vmem:[%s3223_s13] ss:$0 sm:$0xff] }
  0x17   :  { %284 = vmatpush.bf16.msrb.mxu0 %v1763_v28  ;;  %v2175_v28 = vld [vmem:[%s3226_s14 + $0x44] sm:$0xf0] }
  0x18   :  { %v1816_v30 = vor.u32 %v2175_v28, %v1815_v27 }
  0x19   :  { %169 = vmatpush.bf16.msra.mxu1 %v2433_v5  ;;  %188 = vmatpush.bf16.msra.mxu2 %v2433_v5 }
  0x1b   :  { %285 = vmatpush.bf16.msrb.mxu0 %v1755_v36  ;;  %v2172_v36 = vld [vmem:[%s3226_s14 + $0x34] sm:$0xf] }
  0x1d   :  { %170 = vmatpush.bf16.msra.mxu1 %v2441_v6  ;;  %189 = vmatpush.bf16.msra.mxu2 %v2441_v6 }
  0x1f   :  { %286 = vmatpush.bf16.msrb.mxu0 %v1747_v40  ;;  %v1812_v40 = vor.u32 %v2172_v36, %v1809_v38 }
  0x8f   :  { %v128_v8 = vpop.f32.mrf.mxu0 }
  0x90   :  { %v2448_v9 = vadd.f32 %v2222_v7, %v128_v8  ;;  %v1839_v7 = vld [vmem:[%s3226_s14 + $0x70] sm:$0xf]  ;;  %v2181_v8 = vld [vmem:[%s3226_s14 + $0x74] sm:$0xf0] }
  0x92   :  { %v134_v10 = vpack.c.bf16 %v2448_v9, %v2448_v9 }
  0x94   :  { %1738 = vmatmul.msk.bf16.vlgmr.msra.gmra.mxu1 %vm159_vm1, %v134_v10  ;;  %v2180_v10 = vld [vmem:[%s3226_s14 + $0x74] sm:$0xf] }
  0x97   :  { %v130_v11 = vpop.f32.mrf.mxu0 }
  0x98   :  { %v1840_v11 = vor.u32 %v2181_v8, %v1839_v7  ;;  %v1783_v8 = vld [vmem:[%s3226_s14] sm:$0xf] }
  0x9a   :  { %464 = vmatpush.bf16.msrb.mxu2 %v1840_v11  ;;  %v2166_v11 = vld [vmem:[%s3226_s14 + $0x4] sm:$0xf] }
 0x111   :  { %v172_v12 = vpop.f32.mrf.mxu1 }
 0x112   :  { %v176_v13 = vsub.f32 %v2448_v9, %v172_v12  ;;  %v1841_v12 = vld [vmem:[%s3226_s14 + $0x78] sm:$0xf0] }
 0x114   :  { %v177_v14 = vmul.f32 %v176_v13, %v176_v13 }
 0x116   :  { %v178_v15 = vpack.c.bf16 %v177_v14, %v177_v14  ;;  %v1831_v14 = vld [vmem:[%s3226_s14 + $0x60] sm:$0xf] }
 0x118   :  { %1739 = vmatmul.msk.bf16.vlgmr.msra.gmra.mxu2 %vm159_vm1, %v178_v15  ;;  %v2179_v15 = vld [vmem:[%s3226_s14 + $0x64] sm:$0xf0] }
 0x119   :  { %v174_v16 = vpop.f32.mrf.mxu1  ;;  %v1832_v17 = vor.u32 %v2179_v15, %v1831_v14 }
 0x11a   :  { %v2178_v16 = vld [vmem:[%s3226_s14 + $0x64] sm:$0xf] }
 0x11b   :  { %v1836_v19 = vor.u32 %v2178_v16, %v1833_v18  ;;  %465 = vmatpush.bf16.msrb.mxu2 %v1832_v17 }
 0x11f   :  { %466 = vmatpush.bf16.msrb.mxu2 %v1824_v23 }
 0x123   :  { %467 = vmatpush.bf16.msrb.mxu2 %v1816_v30 }
 0x127   :  { %468 = vmatpush.bf16.msrb.mxu2 %v1808_v37 }
 0x19b   :  { %v191_v41 = vpop.f32.mrf.mxu2 }
 0x19c   :  { %v192_v42 = vadd.f32 1e-05, %v191_v41  ;;  %v331_v41 = vperm.slane %v292_v33, 3 }
 0x19e   :  { %2235 = vrsqrt.f32 %v192_v42  ;;  %vm201_vm3 = vweird.f32 %v192_v42 }
 0x1a3   :  { %v193_v43 = vpop.f32.mrf.mxu2 }
 0x1a4   :  { %v2236_v44 = vpop.eup %2235  ;;  %v336_v43 = vperm.slane %v292_v33, 1 }
 0x1a5   :  { %v196_v45 = vmul.f32 %v2236_v44, %v192_v42  ;;  %vm202_vm2 = vweird.f32 %v2236_v44 }
 0x1a6   :  { %vm203_vm4 = vmor %vm201_vm3, %vm202_vm2 }
 0x1a7   :  { %v197_v46 = vmul.f32 %v2236_v44, %v196_v45  ;;  %v2171_v45 = vld [vmem:[%s3226_s14 + $0x24] sm:$0xf0] }
 0x1a9   :  { %v198_v47 = vmul.f32 0.5, %v197_v46  ;;  %v2170_v46 = vld [vmem:[%s3226_s14 + $0x24] sm:$0xf] }
 0x1ab   :  { %v199_v48 = vsub.f32 1.5, %v198_v47 }
 0x1ad   :  { %v200_v49 = vmul.f32 %v2236_v44, %v199_v48  ;;  %v1801_v48 = vld [vmem:[%s3226_s14 + $0x28] sm:$0xf0] }
 0x1af   :  { %v204_v51 = vsel %vm203_vm4, %v2236_v44, %v200_v49  ;;  %v1799_v44 = vld [vmem:[%s3226_s14 + $0x20] sm:$0xf] }
 0x1b0   :  { %v205_v52 = vmul.f32 %v204_v51, %v176_v13  ;;  %v1844_v13 = vor.u32 %v2180_v10, %v1841_v12  ;;  %v1800_v47 = vor.u32 %v2171_v45, %v1799_v44  ;;  %v339_v51 = vperm.slane %v292_v33, 0  ;;  %v2167_v10 = vld [vmem:[%s3226_s14 + $0x4] sm:$0xf0]  ;;  %v2228_v33 = vld [vmem:[%s3225_s15] ss:$0 sm:$0xff] }
 0x1b1   :  { %v1784_v12 = vor.u32 %v2167_v10, %v1783_v8  ;;  %v1883_v8 = vld [vmem:[%s3229_s6 + $0x10] sm:$0xf]  ;;  %v2155_v10 = vld [vmem:[%s3229_s6 + $0x14] sm:$0xf0] }
 0x1b2   :  { %v209_v54 = vmul.f32 %v2223_v50, %v205_v52  ;;  %477 = vmatpush.bf16.msrb.mxu3 %v1844_v13  ;;  %v1804_v50 = vor.u32 %v2170_v46, %v1801_v48  ;;  %469 = vmatpush.bf16.msrb.mxu2 %v1800_v47  ;;  %v1785_v13 = vld [vmem:[%s3226_s14 + $0x8] sm:$0xf0] }
 0x1b3   :  { %v1788_v15 = vor.u32 %v2166_v11, %v1785_v13  ;;  %v2653_v48 = vld [vmem:[%s3228_s3 + $0x8] sm:$0xff]  ;;  %v2154_v11 = vld [vmem:[%s3229_s6 + $0x14] sm:$0xf]  ;;  %v1885_v13 = vld [vmem:[%s3229_s6 + $0x18] sm:$0xf0] }
 0x1b4   :  { %v213_v55 = vadd.f32 %v2224_v53, %v209_v54  ;;  %v1791_v54 = vld [vmem:[%s3226_s14 + $0x10] sm:$0xf] }
 0x1b6   :  { %v222_v56 = vpack.c.bf16 %v213_v55, %v213_v55  ;;  %478 = vmatpush.bf16.msrb.mxu3 %v1836_v19  ;;  %v2169_v55 = vld [vmem:[%s3226_s14 + $0x14] sm:$0xf0] }
 0x1b8   :  { %1772 = vmatmul.msk.bf16.vlgmr.msra.gmra.mxu3 %vm159_vm1, %v222_v56  ;;  %1773 = vmatmul.msk.bf16.vlgmr.msrb.gmra.mxu0 %vm159_vm1, %v222_v56  ;;  %v2168_v56 = vld [vmem:[%s3226_s14 + $0x14] sm:$0xf] }
 0x1ba   :  { %479 = vmatpush.bf16.msrb.mxu3 %v1828_v25 }
 0x1be   :  { %480 = vmatpush.bf16.msrb.mxu3 %v1820_v32 }
 0x1c2   :  { %481 = vmatpush.bf16.msrb.mxu3 %v1812_v40  ;;  %v2646_v40 = vld [vmem:[%s3228_s3] sm:$0xff] }
 0x1c6   :  { %482 = vmatpush.bf16.msrb.mxu3 %v1804_v50 }
 0x235   :  { %v2511_v57 = vpop.f32.mrf.mxu0 }
 0x23b   :  { %v2513_v58 = vpop.f32.mrf.mxu3 }
 0x23c   :  { %v293_v59 = vpack.c.bf16 %v2513_v58, %v2513_v58  ;;  %v332_v52 = vmul.f32 %v331_v41, %v2513_v58 }
 0x23d   :  { %v290_v60 = vpop.f32.mrf.mxu0 }
 0x23e   :  { %v311_v61 = vsel %vm309_vm5, %v293_v59, 0  ;;  %v1792_v59 = vor.u32 %v2169_v55, %v1791_v54  ;;  %v1793_v60 = vld [vmem:[%s3226_s14 + $0x18] sm:$0xf0] }
 0x23f   :  { %320 = vmatpush.bf16.msrb.mxu1 %v311_v61  ;;  %v1796_v61 = vor.u32 %v2168_v56, %v1793_v60 }
 0x240   :  { %470 = vmatpush.bf16.msrb.mxu2 %v1792_v59 }
 0x241   :  { %483 = vmatpush.bf16.msrb.mxu3 %v1796_v61 }
 0x242   :  { %1778 = vmatmul.msk.bf16.vlgmr.msrb.gmra.mxu1 %vm302_vm6, %v2521_v62 }
 0x243   :  { %v277_v63 = vpop.f32.mrf.mxu3 }
 0x244   :  { %471 = vmatpush.bf16.msrb.mxu2 %v1784_v12  ;;  %v2699_v12 = vor.u32 %v2155_v10, %v1883_v8  ;;  %v749_v10 = vld [vmem:[%s3231_s16 + $0x8] sm:$0xff] }
 0x245   :  { %484 = vmatpush.bf16.msrb.mxu3 %v1788_v15  ;;  %v1875_v15 = vld [vmem:[%s3229_s6] sm:$0xf] }
 0x249   :  { %696 = vmatpush.bf16.msra.mxu3 %v2699_v12 }
 0x252   :  { %1779 = vmatmul.msk.bf16.gmra.mxu1 %vm302_vm6, %v2528_v3 }
 0x2bf   :  { %v322_v26 = vpop.f32.mrf.mxu1 }
 0x2c0   :  { %v334_v49 = vmul.f32 %v333_v39, %v322_v26 }
 0x2c2   :  { %v335_v58 = vadd.f32 %v334_v49, %v332_v52 }
 0x2c7   :  { %v324_v42 = vpop.f32.mrf.mxu1 }
 0x2c8   :  { %v337_v53 = vmul.f32 %v336_v43, %v324_v42 }
 0x2ca   :  { %v338_v1 = vadd.f32 %v337_v53, %v335_v58 }
 0x2cf   :  { %v327_v63 = vpop.f32.mrf.mxu1 }
 0x2d0   :  { %v340_v7 = vmul.f32 %v339_v51, %v327_v63 }
 0x2d2   :  { %v341_v14 = vadd.f32 %v340_v7, %v338_v1  ;;  %v2663_v1 = vld [vmem:[%s3228_s3 + $0x10] sm:$0xff]  ;;  %v2674_v7 = vld [vmem:[%s3228_s3 + $0x18] sm:$0xff] }
 0x2d4   :  { %v346_v16 = vadd.f32 %v2227_v0, %v341_v14  ;;  %v2704_v14 = vor.u32 %v2154_v11, %v1885_v13 }
 0x2d6   :  { %v1780_v17 = vmul.f32 -1.442695, %v346_v16 }
 0x2d7   :  { %v329_v18 = vpop.f32.mrf.mxu1 }
 0x2d8   :  { %2237 = vpow2.f32 %v1780_v17  ;;  %v2152_v17 = vld [vmem:[%s3229_s6 + $0x4] sm:$0xf] }
 0x2de   :  { %v2238_v19 = vpop.eup %2237 }
 0x2df   :  { %v350_v20 = vadd.f32 1.0, %v2238_v19  ;;  %v1877_v19 = vld [vmem:[%s3229_s6 + $0x8] sm:$0xf0] }
 0x2e1   :  { %2239 = vrcp.f32 %v350_v20  ;;  %v362_v24 = vand.u32 2147483648, %v350_v20  ;;  %v360_v26 = vand.u32 2147483647, %v350_v20  ;;  %vm356_vm8 = vweird.f32 %v350_v20 }
 0x2e3   :  { %v363_v28 = vor.u32 1.1754944e-38, %v362_v24  ;;  %vm361_vm10 = vcmp.eq.f32.partialorder %v360_v26, 8.507059e+37 }
 0x2e7   :  { %v2240_v21 = vpop.eup %2239 }
 0x2e8   :  { %v352_v22 = vmul.f32 %v2240_v21, %v350_v20  ;;  %vm357_vm7 = vweird.f32 %v2240_v21  ;;  %v2722_v20 = vor.u32 %v2152_v17, %v1877_v19 }
 0x2e9   :  { %vm358_vm9 = vmor %vm356_vm8, %vm357_vm7 }
 0x2ea   :  { %v353_v23 = vsub.f32 1.0, %v352_v22  ;;  %v2733_v22 = vld [vmem:[%s3230_s5] sm:$0xff] }
 0x2ec   :  { %v354_v25 = vmul.f32 %v2240_v21, %v353_v23  ;;  %v2738_v23 = vld [vmem:[%s3230_s5 + $0x8] sm:$0xff] }
 0x2ee   :  { %v355_v27 = vadd.f32 %v2240_v21, %v354_v25 }
 0x2f0   :  { %v359_v29 = vsel %vm358_vm9, %v2240_v21, %v355_v27 }
 0x2f1   :  { %v364_v30 = vsel %vm361_vm10, %v363_v28, %v359_v29  ;;  %v2747_v29 = vld [vmem:[%s3230_s5 + $0x10] sm:$0xff] }
 0x2f2   :  { %v2635_v31 = vmul.f32 %v364_v30, %v346_v16  ;;  %v2153_v16 = vld [vmem:[%s3229_s6 + $0x4] sm:$0xf0]  ;;  %v2752_v30 = vld [vmem:[%s3230_s5 + $0x18] sm:$0xff] }
 0x2f3   :  { %v2717_v18 = vor.u32 %v2153_v16, %v1875_v15  ;;  %v750_v15 = vld [vmem:[%s3231_s16 + $0x10] sm:$0xff] }
 0x2f4   :  { %v383_v32 = vpack.c.bf16 %v2635_v31, %v2635_v31 }
 0x2f5   :  { %697 = vmatpush.bf16.msra.mxu3 %v2717_v18 }
 0x2f6   :  { %472 = vmatmul.bf16.vlgmr.msrb.gmra.mxu2 %v383_v32  ;;  %485 = vmatmul.bf16.vlgmr.msrb.gmra.mxu3 %v383_v32 }
 0x2f9   :  { %949 = vmatpush.bf16.msrb.mxu3 %v2420_v2 }
 0x2fd   :  { %950 = vmatpush.bf16.msrb.mxu3 %v2426_v4 }
 0x301   :  { %951 = vmatpush.bf16.msrb.mxu3 %v2433_v5 }
 0x305   :  { %952 = vmatpush.bf16.msrb.mxu3 %v2441_v6 }
 0x379   :  { %v473_v34 = vpop.f32.mrf.mxu2  ;;  %v486_v35 = vpop.f32.mrf.mxu3 }
 0x37a   :  { %v494_v36 = vadd.f32 %v2228_v33, %v473_v34  ;;  %v516_v37 = vpack.c.bf16 %v486_v35, %v486_v35 }
 0x37c   :  { %v498_v38 = vand.u32 2147483647, %v494_v36  ;;  %v556_v39 = vsel %vm309_vm5, %v516_v37, 0  ;;  %v495_v54 = vmax.f32 %v494_v36, 0.0  ;;  %vm496_vm12 = vcmp.ne.f32.partialorder %v494_v36, %v494_v36  ;;  %v2761_v37 = vld [vmem:[%s3230_s5 + $0x20] sm:$0xff] }
 0x37d   :  { %623 = vmatpush.bf16.msra.mxu2 %v556_v39 }
 0x37e   :  { %v499_v41 = vsub.f32 0.0, %v498_v38  ;;  %v2766_v38 = vld [vmem:[%s3230_s5 + $0x28] sm:$0xff] }
 0x380   :  { %v500_v42 = vmul.f32 1.442695, %v499_v41  ;;  %1869 = vmatmul.msk.bf16.vlgmr.msra.gmra.mxu2 %vm302_vm6, %v2646_v40 }
 0x381   :  { %v475_v43 = vpop.f32.mrf.mxu2  ;;  %v488_v44 = vpop.f32.mrf.mxu3 }
 0x382   :  { %2241 = vpow2.f32 %v500_v42 }
 0x388   :  { %v2242_v45 = vpop.eup %2241 }
 0x389   :  { %v502_v46 = vadd.f32 1.0, %v2242_v45  ;;  %v505_v47 = vmul.f32 -0.5, %v2242_v45  ;;  %v508_v50 = vand.u32 2147483647, %v2242_v45 }
 0x38b   :  { %2243 = vlog2.f32 %v502_v46  ;;  %v506_v49 = vadd.f32 1.0, %v505_v47  ;;  %vm509_vm11 = vcmp.lt.f32.partialorder %v508_v50, 0.0004427343  ;;  %v2780_v46 = vld [vmem:[%s3230_s5 + $0x38] sm:$0xff] }
 0x38d   :  { %v507_v53 = vmul.f32 %v2242_v45, %v506_v49  ;;  %v2775_v45 = vld [vmem:[%s3230_s5 + $0x30] sm:$0xff]  ;;  %s3254_s5 = sld [smem:[#allocation8_spill]] }
 0x390   :  { %1870 = vmatmul.msk.bf16.gmra.mxu2 %vm302_vm6, %v2653_v48 }
 0x391   :  { %v2244_v51 = vpop.eup %2243 }
 0x392   :  { %v504_v52 = vmul.f32 0.6931472, %v2244_v51 }
 0x394   :  { %v510_v55 = vsel %vm509_vm11, %v507_v53, %v504_v52 }
 0x395   :  { %v511_v56 = vadd.f32 %v510_v55, %v495_v54 }
 0x397   :  { %v512_v59 = vsel %vm496_vm12, %v494_v36, %v511_v56 }
 0x398   :  { %v514_v60 = vpack.c.bf16 %v512_v59, %v512_v59  ;;  %v513_v58 = vmul.f32 %v512_v59, %v2635_v31 }
 0x39a   :  { %v550_v61 = vsel %vm309_vm5, %v514_v60, 0  ;;  %v515_v63 = vpack.c.bf16 %v513_v58, %v513_v58  ;;  %v748_v58 = vld [vmem:[%s3231_s16] sm:$0xff] }
 0x39b   :  { %565 = vmatpush.bf16.msra.mxu0 %v550_v61 }
 0x39c   :  { %v553_v0 = vsel %vm309_vm5, %v515_v63, 0 }
 0x39d   :  { %594 = vmatpush.bf16.msra.mxu1 %v553_v0 }
 0x39e   :  { %1861 = vmatmul.msk.bf16.vlgmr.msra.gmra.mxu0 %vm302_vm6, %v2646_v40 }
 0x39f   :  { %725 = vmatpush.bf16.msrb.mxu0 %v2704_v14 }
 0x3a0   :  { %1871 = vmatmul.msk.bf16.gmra.mxu2 %vm302_vm6, %v2663_v1  ;;  %1865 = vmatmul.msk.bf16.vlgmr.msra.gmra.mxu1 %vm302_vm6, %v2646_v40 }
 0x3a3   :  { %726 = vmatpush.bf16.msrb.mxu0 %v2722_v20 }
 0x3ae   :  { %1862 = vmatmul.msk.bf16.gmra.mxu0 %vm302_vm6, %v2653_v48 }
 0x3b0   :  { %1872 = vmatmul.msk.bf16.gmra.mxu2 %vm302_vm6, %v2674_v7  ;;  %1866 = vmatmul.msk.bf16.gmra.mxu1 %vm302_vm6, %v2653_v48 }
 0x3be   :  { %1863 = vmatmul.msk.bf16.gmra.mxu0 %vm302_vm6, %v2663_v1 }
 0x3c0   :  { %1867 = vmatmul.msk.bf16.gmra.mxu1 %vm302_vm6, %v2663_v1 }
 0x3ce   :  { %1864 = vmatmul.msk.bf16.gmra.mxu0 %vm302_vm6, %v2674_v7 }
 0x3d0   :  { %1868 = vmatmul.msk.bf16.gmra.mxu1 %vm302_vm6, %v2674_v7 }
 0x403   :  { %v625_v21 = vpop.f32.mrf.mxu2 }
 0x404   :  { %v645_v25 = vmul.f32 %v625_v21, %v2733_v22 }
 0x40b   :  { %v627_v24 = vpop.f32.mrf.mxu2 }
 0x40c   :  { %v646_v26 = vmul.f32 %v627_v24, %v2738_v23 }
 0x40e   :  { %v653_v27 = vpack.c.bf16 %v646_v26, %v645_v25 }
 0x410   :  { %1889 = vmatmul.msk.bf16.vlgmr.msra.gmra.mxu3 %vm677_vm13, %v653_v27  ;;  %1893 = vmatmul.msk.bf16.vlgmr.msrb.gmra.mxu0 %vm677_vm13, %v653_v27 }
 0x413   :  { %v630_v28 = vpop.f32.mrf.mxu2 }
 0x414   :  { %v647_v33 = vmul.f32 %v630_v28, %v2747_v29 }
 0x41b   :  { %v632_v32 = vpop.f32.mrf.mxu2  ;;  %v567_v51 = vpop.f32.mrf.mxu0 }
 0x41c   :  { %v648_v34 = vmul.f32 %v632_v32, %v2752_v30  ;;  %v756_v61 = vmul.f32 %v748_v58, %v567_v51 }
 0x41d   :  { %v596_v0 = vpop.f32.mrf.mxu1 }
 0x41e   :  { %v654_v35 = vpack.c.bf16 %v648_v34, %v647_v33  ;;  %v764_v8 = vmul.f32 1.442695, %v756_v61  ;;  %v752_v61 = vld [vmem:[%s3231_s16 + $0x20] sm:$0xff] }
 0x420   :  { %1890 = vmatmul.msk.bf16.gmra.mxu3 %vm677_vm13, %v654_v35  ;;  %1894 = vmatmul.msk.bf16.gmra.mxu0 %vm677_vm13, %v654_v35  ;;  %2245 = vpow2.f32 %v764_v8 }
 0x423   :  { %v635_v36 = vpop.f32.mrf.mxu2  ;;  %v569_v53 = vpop.f32.mrf.mxu0 }
 0x424   :  { %v649_v41 = vmul.f32 %v635_v36, %v2761_v37  ;;  %v757_v11 = vmul.f32 %v749_v10, %v569_v53 }
 0x425   :  { %v598_v16 = vpop.f32.mrf.mxu1 }
 0x426   :  { %v2246_v17 = vpop.eup %2245  ;;  %v766_v19 = vmul.f32 1.442695, %v757_v11 }
 0x427   :  { %v788_v25 = vmul.f32 0.0, %v2246_v17 }
 0x428   :  { %2247 = vpow2.f32 %v766_v19 }
 0x42b   :  { %v637_v39 = vpop.f32.mrf.mxu2  ;;  %v572_v54 = vpop.f32.mrf.mxu0 }
 0x42c   :  { %v650_v42 = vmul.f32 %v637_v39, %v2766_v38  ;;  %v758_v21 = vmul.f32 %v750_v15, %v572_v54  ;;  %v753_v15 = vld [vmem:[%s3231_s16 + $0x28] sm:$0xff] }
 0x42d   :  { %v601_v34 = vpop.f32.mrf.mxu1 }
 0x42e   :  { %v655_v43 = vpack.c.bf16 %v650_v42, %v649_v41  ;;  %v768_v27 = vmul.f32 1.442695, %v758_v21  ;;  %v2248_v35 = vpop.eup %2247 }
 0x430   :  { %1891 = vmatmul.msk.bf16.gmra.mxu3 %vm677_vm13, %v655_v43  ;;  %1895 = vmatmul.msk.bf16.gmra.mxu0 %vm677_vm13, %v655_v43  ;;  %2249 = vpow2.f32 %v768_v27 }
 0x433   :  { %v640_v44 = vpop.f32.mrf.mxu2  ;;  %v574_v55 = vpop.f32.mrf.mxu0 }
 0x434   :  { %v651_v49 = vmul.f32 %v640_v44, %v2775_v45 }
 0x436   :  { %v2250_v44 = vpop.eup %2249 }
 0x43b   :  { %v642_v47 = vpop.f32.mrf.mxu2  ;;  %v577_v56 = vpop.f32.mrf.mxu0 }
 0x43c   :  { %v652_v50 = vmul.f32 %v642_v47, %v2780_v46  ;;  %v760_v8 = vmul.f32 %v752_v61, %v577_v56  ;;  %v754_v56 = vld [vmem:[%s3231_s16 + $0x30] sm:$0xff] }
 0x43e   :  { %v656_v52 = vpack.c.bf16 %v652_v50, %v651_v49  ;;  %v751_v50 = vld [vmem:[%s3231_s16 + $0x18] sm:$0xff] }
 0x43f   :  { %v759_v54 = vmul.f32 %v751_v50, %v574_v55 }
 0x440   :  { %1892 = vmatmul.msk.bf16.gmra.mxu3 %vm677_vm13, %v656_v52  ;;  %1896 = vmatmul.msk.bf16.gmra.mxu0 %vm677_vm13, %v656_v52  ;;  %v603_v52 = vpop.f32.mrf.mxu1 }
 0x443   :  { %v579_v59 = vpop.f32.mrf.mxu0 }
 0x444   :  { %v761_v55 = vmul.f32 %v753_v15, %v579_v59  ;;  %v755_v59 = vld [vmem:[%s3231_s16 + $0x38] sm:$0xff] }
 0x446   :  { %v774_v27 = vmul.f32 1.442695, %v761_v55 }
 0x44b   :  { %v582_v60 = vpop.f32.mrf.mxu0 }
 0x453   :  { %v2789_v63 = vpop.f32.mrf.mxu0 }
 0x454   :  { %v763_v50 = vmul.f32 %v755_v59, %v2789_v63  ;;  %v2188_v63 = vld [vmem:[%s3232_s18 + $0x30] sm:$0xff] }
 0x48d   :  { %v728_v13 = vpop.f32.mrf.mxu0 }
 0x493   :  { %v699_v24 = vpop.f32.mrf.mxu3 }
 0x494   :  { %v780_v26 = vmul.f32 %v699_v24, %v596_v0  ;;  %v770_v0 = vmul.f32 1.442695, %v759_v54 }
 0x495   :  { %v730_v28 = vpop.f32.mrf.mxu0 }
 0x496   :  { %v789_v32 = vadd.f32 %v788_v25, %v780_v26  ;;  %2251 = vpow2.f32 %v770_v0 }
 0x498   :  { %v2797_v33 = vmul.f32 %v789_v32, %v728_v13  ;;  %v790_v39 = vmul.f32 %v2248_v35, %v789_v32  ;;  %v606_v13 = vpop.f32.mrf.mxu1  ;;  %v762_v32 = vmul.f32 %v754_v56, %v582_v60  ;;  %v778_v60 = vmul.f32 1.442695, %v763_v50 }
 0x49b   :  { %v701_v36 = vpop.f32.mrf.mxu3 }
 0x49c   :  { %v781_v41 = vmul.f32 %v701_v36, %v598_v16  ;;  %v772_v16 = vmul.f32 1.442695, %v760_v8  ;;  %v2252_v24 = vpop.eup %2251 }
 0x49d   :  { %v2799_v42 = vpop.f32.mrf.mxu0 }
 0x49e   :  { %v791_v43 = vadd.f32 %v790_v39, %v781_v41  ;;  %2253 = vpow2.f32 %v772_v16  ;;  %v776_v41 = vmul.f32 1.442695, %v762_v32  ;;  %v2186_v32 = vld [vmem:[%s3232_s18 + $0x20] sm:$0xff] }
 0x49f   :  { %2255 = vpow2.f32 %v774_v27 }
 0x4a0   :  { %v2801_v47 = vmul.f32 %v791_v43, %v730_v28  ;;  %v792_v49 = vmul.f32 %v2250_v44, %v791_v43  ;;  %2257 = vpow2.f32 %v776_v41 }
 0x4a1   :  { %2259 = vpow2.f32 %v778_v60 }
 0x4a2   :  { %v812_v51 = vpack.c.bf16 %v2801_v47, %v2797_v33 }
 0x4a3   :  { %v704_v53 = vpop.f32.mrf.mxu3 }
 0x4a4   :  { %v782_v11 = vmul.f32 %v704_v53, %v601_v34  ;;  %v608_v34 = vpop.f32.mrf.mxu1  ;;  %v2254_v36 = vpop.eup %2253 }
 0x4a5   :  { %v2808_v58 = vpop.f32.mrf.mxu0  ;;  %v2256_v53 = vpop.eup %2255 }
 0x4a6   :  { %v2816_v17 = vadd.f32 %v792_v49, %v782_v11 }
 0x4a8   :  { %v794_v26 = vmul.f32 %v2252_v24, %v2816_v17  ;;  %v806_v60 = vmul.f32 %v2816_v17, %v2799_v42  ;;  %v1898_v42 = vmul.f32 -1.442695, %v2511_v57 }
 0x4aa   :  { %2261 = vpow2.f32 %v1898_v42  ;;  %v2193_v42 = vld [vmem:[%s3221_s11 + $0x54] sm:$0xf0] }
 0x4ab   :  { %v706_v10 = vpop.f32.mrf.mxu3 }
 0x4ac   :  { %v783_v21 = vmul.f32 %v706_v10, %v603_v52  ;;  %v611_v61 = vpop.f32.mrf.mxu1  ;;  %v2189_v10 = vld [vmem:[%s3232_s18 + $0x38] sm:$0xff] }
 0x4ad   :  { %v738_v19 = vpop.f32.mrf.mxu0  ;;  %923 = vmatpush.bf16.msrb.mxu2 %v2189_v10 }
 0x4ae   :  { %v795_v28 = vadd.f32 %v794_v26, %v783_v21  ;;  %v2187_v21 = vld [vmem:[%s3232_s18 + $0x28] sm:$0xff] }
 0x4b0   :  { %v796_v39 = vmul.f32 %v2254_v36, %v795_v28 }
 0x4b1   :  { %924 = vmatpush.bf16.msrb.mxu2 %v2188_v63 }
 0x4b3   :  { %v709_v25 = vpop.f32.mrf.mxu3 }
 0x4b4   :  { %v784_v35 = vmul.f32 %v709_v25, %v606_v13  ;;  %v2258_v13 = vpop.eup %2257  ;;  %v613_v25 = vpop.f32.mrf.mxu1 }
 0x4b5   :  { %v740_v43 = vpop.f32.mrf.mxu0  ;;  %v2260_v24 = vpop.eup %2259  ;;  %925 = vmatpush.bf16.msrb.mxu2 %v2187_v21 }
 0x4b6   :  { %v797_v49 = vadd.f32 %v796_v39, %v784_v35  ;;  %v2185_v39 = vld [vmem:[%s3232_s18 + $0x18] sm:$0xff]  ;;  %v2262_v33 = vpop.eup %2261 }
 0x4b7   :  { %v840_v47 = vadd.f32 1.0, %v2262_v33  ;;  %v2192_v33 = vld [vmem:[%s3221_s11 + $0x54] sm:$0xf] }
 0x4b8   :  { %v798_v54 = vmul.f32 %v2256_v53, %v797_v49  ;;  %v808_v50 = vmul.f32 %v797_v49, %v738_v19  ;;  %v807_v53 = vmul.f32 %v795_v28, %v2808_v58  ;;  %v2853_v19 = vld [vmem:[%s3233_s4] sm:$0xf] }
 0x4b9   :  { %926 = vmatpush.bf16.msrb.mxu2 %v2186_v32  ;;  %2263 = vrcp.f32 %v840_v47  ;;  %v852_v28 = vand.u32 2147483648, %v840_v47  ;;  %vm846_vm15 = vweird.f32 %v840_v47 }
 0x4bb   :  { %v711_v44 = vpop.f32.mrf.mxu3 }
 0x4bc   :  { %v785_v52 = vmul.f32 %v711_v44, %v608_v34 }
 0x4bd   :  { %v743_v15 = vpop.f32.mrf.mxu0  ;;  %927 = vmatpush.bf16.msrb.mxu2 %v2185_v39  ;;  %v1971_v39 = vld [vmem:[%s3221_s11 + $0x78] sm:$0xf0] }
 0x4be   :  { %v799_v0 = vadd.f32 %v798_v54, %v785_v52  ;;  %v2184_v52 = vld [vmem:[%s3232_s18 + $0x10] sm:$0xff] }
 0x4c0   :  { %v800_v16 = vmul.f32 %v2258_v13, %v799_v0  ;;  %v809_v41 = vmul.f32 %v799_v0, %v740_v43  ;;  %v850_v43 = vand.u32 2147483647, %v840_v47  ;;  %v2229_v0 = vld [vmem:[%s3254_s5] ss:$0 sm:$0xff] }
 0x4c1   :  { %928 = vmatpush.bf16.msrb.mxu2 %v2184_v52  ;;  %v2194_v52 = vld [vmem:[%s3221_s11 + $0x64] sm:$0xf] }
 0x4c2   :  { %v814_v54 = vpack.c.bf16 %v809_v41, %v808_v50  ;;  %vm851_vm2 = vcmp.eq.f32.partialorder %v850_v43, 8.507059e+37  ;;  %v2195_v50 = vld [vmem:[%s3221_s11 + $0x64] sm:$0xf0] }
 0x4c3   :  { %v714_v8 = vpop.f32.mrf.mxu3 }
 0x4c4   :  { %v786_v11 = vmul.f32 %v714_v8, %v611_v61  ;;  %v813_v61 = vpack.c.bf16 %v807_v53, %v806_v60  ;;  %v853_v8 = vor.u32 1.1754944e-38, %v852_v28 }
 0x4c5   :  { %v745_v35 = vpop.f32.mrf.mxu0 }
 0x4c6   :  { %v801_v55 = vadd.f32 %v800_v16, %v786_v11  ;;  %v820_v11 = vmul.f32 %v2229_v0, %v2635_v31 }
 0x4c8   :  { %v802_v27 = vmul.f32 %v2260_v24, %v801_v55  ;;  %v810_v36 = vmul.f32 %v801_v55, %v743_v15 }
 0x4cb   :  { %v716_v56 = vpop.f32.mrf.mxu3 }
 0x4cc   :  { %v787_v26 = vmul.f32 %v716_v56, %v613_v25 }
 0x4ce   :  { %v803_v34 = vadd.f32 %v802_v27, %v787_v26 }
 0x4d0   :  { %v811_v59 = vmul.f32 %v803_v34, %v745_v35  ;;  %v1969_v35 = vld [vmem:[%s3221_s11 + $0x70] sm:$0xf] }
 0x4d2   :  { %v815_v44 = vpack.c.bf16 %v811_v59, %v810_v36  ;;  %v2196_v36 = vld [vmem:[%s3221_s11 + $0x74] sm:$0xf] }
 0x4d3   :  { %v1974_v41 = vor.u32 %v2196_v36, %v1971_v39  ;;  %v2056_v36 = vld [vmem:[%s3226_s14 + $0xf0] sm:$0xf]  ;;  %v2212_v39 = vld [vmem:[%s3226_s14 + $0xf4] sm:$0xf] }
 0x4d4   :  { %828 = vmatpush.bf16.msrb.mxu1 %v815_v44  ;;  %v1961_v44 = vld [vmem:[%s3221_s11 + $0x60] sm:$0xf] }
 0x4d5   :  { %1066 = vmatpush.bf16.msra.mxu3 %v1974_v41  ;;  %v1962_v53 = vor.u32 %v2195_v50, %v1961_v44  ;;  %v2211_v50 = vld [vmem:[%s3226_s14 + $0xe4] sm:$0xf0] }
 0x4d8   :  { %829 = vmatpush.bf16.msrb.mxu1 %v814_v54  ;;  %v1963_v54 = vld [vmem:[%s3221_s11 + $0x68] sm:$0xf0] }
 0x4d9   :  { %v1966_v60 = vor.u32 %v2194_v52, %v1963_v54  ;;  %v2210_v52 = vld [vmem:[%s3226_s14 + $0xe4] sm:$0xf]  ;;  %v2050_v54 = vld [vmem:[%s3226_s14 + $0xe8] sm:$0xf0] }
 0x4db   :  { %1067 = vmatpush.bf16.msra.mxu3 %v1966_v60  ;;  %v2053_v60 = vor.u32 %v2210_v52, %v2050_v54 }
 0x4dc   :  { %830 = vmatpush.bf16.msrb.mxu1 %v813_v61  ;;  %v1953_v61 = vld [vmem:[%s3221_s11 + $0x50] sm:$0xf] }
 0x4e0   :  { %831 = vmatpush.bf16.msrb.mxu1 %v812_v51  ;;  %v2183_v51 = vld [vmem:[%s3232_s18 + $0x8] sm:$0xff] }
 0x4e1   :  { %929 = vmatpush.bf16.msrb.mxu2 %v2183_v51  ;;  %v1955_v51 = vld [vmem:[%s3221_s11 + $0x58] sm:$0xf0] }
 0x4e3   :  { %1897 = vmatmul.msk.bf16.vlgmr.msrb.gmra.mxu1 %vm159_vm1, %v2853_v19 }
 0x4e4   :  { %968 = vmatpush.bf16.msra.mxu1 %v2420_v2  ;;  %v2182_v2 = vld [vmem:[%s3232_s18] sm:$0xff] }
 0x4e5   :  { %930 = vmatpush.bf16.msrb.mxu2 %v2182_v2  ;;  %v1958_v2 = vor.u32 %v2192_v33, %v1955_v51  ;;  %v2208_v33 = vld [vmem:[%s3226_s14 + $0xd4] sm:$0xf]  ;;  %v2042_v51 = vld [vmem:[%s3226_s14 + $0xd8] sm:$0xf0] }
 0x4e7   :  { %1068 = vmatpush.bf16.msra.mxu3 %v1958_v2  ;;  %v2045_v2 = vor.u32 %v2208_v33, %v2042_v51  ;;  %v2198_v33 = vld [vmem:[%s3226_s14 + $0x84] sm:$0xf]  ;;  %v2002_v51 = vld [vmem:[%s3226_s14 + $0x88] sm:$0xf0] }
 0x4e8   :  { %969 = vmatpush.bf16.msra.mxu1 %v2426_v4  ;;  %v2264_v4 = vpop.eup %2263 }
 0x4e9   :  { %vm847_vm14 = vweird.f32 %v2264_v4 }
 0x4ea   :  { %vm848_vm0 = vmor %vm846_vm15, %vm847_vm14 }
 0x4ec   :  { %970 = vmatpush.bf16.msra.mxu1 %v2433_v5  ;;  %v842_v5 = vmul.f32 %v2264_v4, %v840_v47  ;;  %v1954_v47 = vor.u32 %v2193_v42, %v1953_v61  ;;  %v2040_v61 = vld [vmem:[%s3226_s14 + $0xd0] sm:$0xf]  ;;  %v2209_v42 = vld [vmem:[%s3226_s14 + $0xd4] sm:$0xf0] }
 0x4ee   :  { %v843_v58 = vsub.f32 1.0, %v842_v5  ;;  %v2191_v5 = vld [vmem:[%s3221_s11 + $0x44] sm:$0xf0] }
 0x4f0   :  { %971 = vmatpush.bf16.msra.mxu1 %v2441_v6  ;;  %v844_v6 = vmul.f32 %v2264_v4, %v843_v58  ;;  %v2190_v58 = vld [vmem:[%s3221_s11 + $0x44] sm:$0xf] }
 0x4f2   :  { %v845_v17 = vadd.f32 %v2264_v4, %v844_v6 }
 0x4f4   :  { %v849_v49 = vsel %vm848_vm0, %v2264_v4, %v845_v17  ;;  %v1945_v4 = vld [vmem:[%s3221_s11 + $0x40] sm:$0xf]  ;;  %v1947_v17 = vld [vmem:[%s3221_s11 + $0x48] sm:$0xf0] }
 0x4f5   :  { %v854_v10 = vsel %vm851_vm2, %v853_v8, %v849_v49  ;;  %v1946_v6 = vor.u32 %v2191_v5, %v1945_v4  ;;  %v1950_v28 = vor.u32 %v2190_v58, %v1947_v17  ;;  %v2032_v5 = vld [vmem:[%s3226_s14 + $0xc0] sm:$0xf]  ;;  %v2207_v58 = vld [vmem:[%s3226_s14 + $0xc4] sm:$0xf0] }
 0x4f6   :  { %v856_v15 = vmul.f32 %v854_v10, %v2511_v57  ;;  %v2033_v17 = vor.u32 %v2207_v58, %v2032_v5 }
 0x4f7   :  { %1069 = vmatpush.bf16.msra.mxu3 %v1950_v28  ;;  %v2034_v28 = vld [vmem:[%s3226_s14 + $0xc8] sm:$0xf0] }
 0x560   :  { %v833_v13 = vpop.f32.mrf.mxu1 }
 0x561   :  { %v834_v63 = vadd.f32 %v833_v13, %v820_v11 }
 0x563   :  { %v857_v16 = vmul.f32 %v856_v15, %v834_v63 }
 0x565   :  { %v874_v55 = vpack.c.bf16 %v857_v16, %v857_v16  ;;  %v2225_v16 = vld [vmem:[%s3252_s28 + $0x1] ss:$0 sm:$0xff] }
 0x567   :  { %931 = vmatmul.bf16.vlgmr.msrb.gmra.mxu2 %v874_v55 }
 0x568   :  { %v835_v21 = vpop.f32.mrf.mxu1 }
 0x569   :  { %v2226_v21 = vld [vmem:[%s3253_s30 + $0x1] ss:$0 sm:$0xff] }
 0x5ea   :  { %v932_v24 = vpop.f32.mrf.mxu2 }
 0x5eb   :  { %v2874_v25 = vadd.f32 %v932_v24, %v2448_v9  ;;  %v2197_v9 = vld [vmem:[%s3221_s11 + $0x74] sm:$0xf0] }
 0x5ec   :  { %v1970_v59 = vor.u32 %v2197_v9, %v1969_v35 }
 0x5ed   :  { %v941_v56 = vpack.c.bf16 %v2874_v25, %v2874_v25 }
 0x5ee   :  { %1053 = vmatpush.bf16.msra.mxu2 %v1970_v59  ;;  %v2213_v59 = vld [vmem:[%s3226_s14 + $0xf4] sm:$0xf0] }
 0x5ef   :  { %1933 = vmatmul.msk.bf16.vlgmr.msrb.gmra.mxu3 %vm159_vm1, %v941_v56  ;;  %v2057_v41 = vor.u32 %v2213_v59, %v2056_v36 }
 0x5f1   :  { %1234 = vmatpush.bf16.msra.mxu0 %v2057_v41  ;;  %v2201_v41 = vld [vmem:[%s3226_s14 + $0x94] sm:$0xf0] }
 0x5f2   :  { %v934_v26 = vpop.f32.mrf.mxu2  ;;  %1054 = vmatpush.bf16.msra.mxu2 %v1962_v53 }
 0x5f6   :  { %1055 = vmatpush.bf16.msra.mxu2 %v1954_v47  ;;  %v2041_v47 = vor.u32 %v2209_v42, %v2040_v61  ;;  %v2000_v61 = vld [vmem:[%s3226_s14 + $0x80] sm:$0xf]  ;;  %v2199_v42 = vld [vmem:[%s3226_s14 + $0x84] sm:$0xf0] }
 0x5fa   :  { %1056 = vmatpush.bf16.msra.mxu2 %v1946_v6  ;;  %v2206_v6 = vld [vmem:[%s3226_s14 + $0xc4] sm:$0xf] }
 0x672   :  { %v954_v27 = vpop.f32.mrf.mxu3 }
 0x673   :  { %v958_v31 = vsub.f32 %v2874_v25, %v954_v27 }
 0x675   :  { %v959_v32 = vmul.f32 %v958_v31, %v958_v31 }
 0x677   :  { %v960_v57 = vpack.c.bf16 %v959_v32, %v959_v32 }
 0x679   :  { %1934 = vmatmul.msk.bf16.vlgmr.msra.gmra.mxu1 %vm159_vm1, %v960_v57 }
 0x67a   :  { %v956_v34 = vpop.f32.mrf.mxu3 }
 0x6f6   :  { %v973_v43 = vpop.f32.mrf.mxu1 }
 0x6f7   :  { %v974_v49 = vadd.f32 1e-05, %v973_v43  ;;  %v2037_v43 = vor.u32 %v2206_v6, %v2034_v28 }
 0x6f9   :  { %2265 = vrsqrt.f32 %v974_v49  ;;  %vm983_vm4 = vweird.f32 %v974_v49 }
 0x6fe   :  { %v975_v0 = vpop.f32.mrf.mxu1 }
 0x6ff   :  { %v2266_v8 = vpop.eup %2265  ;;  %v2024_v0 = vld [vmem:[%s3226_s14 + $0xb0] sm:$0xf] }
 0x700   :  { %v978_v10 = vmul.f32 %v2266_v8, %v974_v49  ;;  %vm984_vm3 = vweird.f32 %v2266_v8  ;;  %v1977_v49 = vld [vmem:[%s3227_s12 + $0x4] sm:$0xf] }
 0x701   :  { %vm985_vm7 = vmor %vm983_vm4, %vm984_vm3 }
 0x702   :  { %v979_v11 = vmul.f32 %v2266_v8, %v978_v10  ;;  %v2204_v10 = vld [vmem:[%s3226_s14 + $0xb4] sm:$0xf] }
 0x704   :  { %v980_v13 = vmul.f32 0.5, %v979_v11 }
 0x706   :  { %v981_v15 = vsub.f32 1.5, %v980_v13  ;;  %v2026_v13 = vld [vmem:[%s3226_s14 + $0xb8] sm:$0xf0] }
 0x708   :  { %v982_v63 = vmul.f32 %v2266_v8, %v981_v15  ;;  %v1101_v15 = vperm.slane %v1977_v49, 2 }
 0x70a   :  { %v986_v55 = vsel %vm985_vm7, %v2266_v8, %v982_v63  ;;  %v2205_v8 = vld [vmem:[%s3226_s14 + $0xb4] sm:$0xf0]  ;;  %v2029_v63 = vor.u32 %v2204_v10, %v2026_v13 }
 0x70b   :  { %v987_v24 = vmul.f32 %v986_v55, %v958_v31  ;;  %v2025_v11 = vor.u32 %v2205_v8, %v2024_v0 }
 0x70d   :  { %v991_v56 = vmul.f32 %v2225_v16, %v987_v24  ;;  %v1099_v16 = vperm.slane %v1977_v49, 3  ;;  %v2016_v24 = vld [vmem:[%s3226_s14 + $0xa0] sm:$0xf] }
 0x70f   :  { %v995_v26 = vadd.f32 %v2226_v21, %v991_v56  ;;  %v1104_v21 = vperm.slane %v1977_v49, 1  ;;  %v2203_v56 = vld [vmem:[%s3226_s14 + $0xa4] sm:$0xf0] }
 0x711   :  { %v1005_v27 = vpack.c.bf16 %v995_v26, %v995_v26  ;;  %v2202_v26 = vld [vmem:[%s3226_s14 + $0xa4] sm:$0xf] }
 0x713   :  { %1975 = vmatmul.msk.bf16.vlgmr.msra.gmra.mxu2 %vm159_vm1, %v1005_v27  ;;  %1976 = vmatmul.msk.bf16.vlgmr.msra.gmra.mxu3 %vm159_vm1, %v1005_v27  ;;  %v2017_v27 = vor.u32 %v2203_v56, %v2016_v24  ;;  %v3072_v24 = vld [vmem:[%s3250_s1 + $0x8] sm:$0xff]  ;;  %v3078_v56 = vld [vmem:[%s3250_s1] sm:$0xff] }
 0x796   :  { %v2937_v32 = vpop.f32.mrf.mxu2  ;;  %v2939_v57 = vpop.f32.mrf.mxu3 }
 0x797   :  { %v1077_v34 = vpack.c.bf16 %v2937_v32, %v2937_v32  ;;  %v1100_v36 = vmul.f32 %v1099_v16, %v2937_v32 }
 0x799   :  { %v1079_v35 = vsel %vm309_vm5, %v1077_v34, 0  ;;  %v2018_v34 = vld [vmem:[%s3226_s14 + $0xa8] sm:$0xf0] }
 0x79a   :  { %1088 = vmatpush.bf16.msrb.mxu1 %v1079_v35 }
 0x79d   :  { %1978 = vmatmul.msk.bf16.vlgmr.msrb.gmra.mxu1 %vm302_vm6, %v2521_v62  ;;  %v2058_v62 = vld [vmem:[%s3226_s14 + $0xf8] sm:$0xf0] }
 0x79e   :  { %v1060_v31 = vpop.f32.mrf.mxu2  ;;  %v1073_v9 = vpop.f32.mrf.mxu3  ;;  %v2061_v44 = vor.u32 %v2212_v39, %v2058_v62  ;;  %v2008_v39 = vld [vmem:[%s3226_s14 + $0x90] sm:$0xf]  ;;  %v2200_v62 = vld [vmem:[%s3226_s14 + $0x94] sm:$0xf] }
 0x79f   :  { %v2021_v31 = vor.u32 %v2202_v26, %v2018_v34  ;;  %v1107_v9 = vperm.slane %v1977_v49, 0  ;;  %v2231_v26 = vld [vmem:[%s3225_s15 + $0x1] ss:$0 sm:$0xff] }
 0x7a0   :  { %1247 = vmatpush.bf16.msrb.mxu2 %v2061_v44  ;;  %v2009_v44 = vor.u32 %v2201_v41, %v2008_v39 }
 0x7a4   :  { %1248 = vmatpush.bf16.msrb.mxu2 %v2053_v60 }
 0x7a8   :  { %1249 = vmatpush.bf16.msrb.mxu2 %v2045_v2 }
 0x7ac   :  { %1250 = vmatpush.bf16.msrb.mxu2 %v2037_v43 }
 0x7ad   :  { %1979 = vmatmul.msk.bf16.gmra.mxu1 %vm302_vm6, %v2528_v3  ;;  %v2048_v3 = vld [vmem:[%s3226_s14 + $0xe0] sm:$0xf] }
 0x7ae   :  { %v2049_v53 = vor.u32 %v2211_v50, %v2048_v3  ;;  %v2010_v3 = vld [vmem:[%s3226_s14 + $0x98] sm:$0xf0] }
 0x7af   :  { %v2013_v50 = vor.u32 %v2200_v62, %v2010_v3 }
 0x7b0   :  { %1235 = vmatpush.bf16.msra.mxu0 %v2049_v53  ;;  %1251 = vmatpush.bf16.msrb.mxu2 %v2029_v63  ;;  %v2230_v53 = vld [vmem:[%s3223_s13 + $0x1] ss:$0 sm:$0xff] }
 0x7b4   :  { %1236 = vmatpush.bf16.msra.mxu0 %v2041_v47  ;;  %1252 = vmatpush.bf16.msrb.mxu2 %v2021_v31  ;;  %v2001_v47 = vor.u32 %v2199_v42, %v2000_v61 }
 0x7b8   :  { %1237 = vmatpush.bf16.msra.mxu0 %v2033_v17  ;;  %1253 = vmatpush.bf16.msrb.mxu2 %v2013_v50 }
 0x7bc   :  { %1238 = vmatpush.bf16.msra.mxu0 %v2025_v11 }
 0x7c0   :  { %1239 = vmatpush.bf16.msra.mxu0 %v2017_v27 }
 0x7c4   :  { %1240 = vmatpush.bf16.msra.mxu0 %v2009_v44 }
 0x7c8   :  { %1241 = vmatpush.bf16.msra.mxu0 %v2001_v47 }
 0x81a   :  { %v1090_v4 = vpop.f32.mrf.mxu1 }
 0x81b   :  { %v1102_v35 = vmul.f32 %v1101_v15, %v1090_v4  ;;  %v2005_v4 = vor.u32 %v2198_v33, %v2002_v51 }
 0x81d   :  { %v1103_v32 = vadd.f32 %v1102_v35, %v1100_v36  ;;  %1254 = vmatpush.bf16.msrb.mxu2 %v2005_v4 }
 0x821   :  { %1414 = vmatpush.bf16.msra.mxu2 %v2699_v12 }
 0x822   :  { %v1092_v55 = vpop.f32.mrf.mxu1 }
 0x823   :  { %v1105_v59 = vmul.f32 %v1104_v21, %v1092_v55  ;;  %v3060_v55 = vld [vmem:[%s3250_s1 + $0x18] sm:$0xff]  ;;  %v3066_v21 = vld [vmem:[%s3250_s1 + $0x10] sm:$0xff] }
 0x825   :  { %v1106_v54 = vadd.f32 %v1105_v59, %v1103_v32  ;;  %1415 = vmatpush.bf16.msra.mxu2 %v2717_v18 }
 0x82a   :  { %v1095_v52 = vpop.f32.mrf.mxu1 }
 0x82b   :  { %v1108_v60 = vmul.f32 %v1107_v9, %v1095_v52 }
 0x82d   :  { %v1109_v2 = vadd.f32 %v1108_v60, %v1106_v54 }
 0x82f   :  { %v1115_v5 = vadd.f32 %v2230_v53, %v1109_v2 }
 0x831   :  { %v1981_v58 = vmul.f32 -1.442695, %v1115_v5 }
 0x832   :  { %v1097_v6 = vpop.f32.mrf.mxu1 }
 0x833   :  { %2267 = vpow2.f32 %v1981_v58 }
 0x839   :  { %v2268_v17 = vpop.eup %2267 }
 0x83a   :  { %v1119_v28 = vadd.f32 1.0, %v2268_v17 }
 0x83c   :  { %2269 = vrcp.f32 %v1119_v28  ;;  %v1131_v8 = vand.u32 2147483648, %v1119_v28  ;;  %v1129_v11 = vand.u32 2147483647, %v1119_v28  ;;  %vm1125_vm9 = vweird.f32 %v1119_v28 }
 0x83e   :  { %v1132_v15 = vor.u32 1.1754944e-38, %v1131_v8  ;;  %vm1130_vm11 = vcmp.eq.f32.partialorder %v1129_v11, 8.507059e+37 }
 0x842   :  { %v2270_v43 = vpop.eup %2269 }
 0x843   :  { %v1121_v49 = vmul.f32 %v2270_v43, %v1119_v28  ;;  %vm1126_vm8 = vweird.f32 %v2270_v43 }
 0x844   :  { %vm1127_vm10 = vmor %vm1125_vm9, %vm1126_vm8 }
 0x845   :  { %v1122_v0 = vsub.f32 1.0, %v1121_v49 }
 0x847   :  { %v1123_v10 = vmul.f32 %v2270_v43, %v1122_v0 }
 0x849   :  { %v1124_v13 = vadd.f32 %v2270_v43, %v1123_v10 }
 0x84b   :  { %v1128_v12 = vsel %vm1127_vm10, %v2270_v43, %v1124_v13 }
 0x84c   :  { %v1133_v63 = vsel %vm1130_vm11, %v1132_v15, %v1128_v12 }
 0x84d   :  { %v3053_v16 = vmul.f32 %v1133_v63, %v1115_v5 }
 0x84f   :  { %v1153_v18 = vpack.c.bf16 %v3053_v16, %v3053_v16 }
 0x851   :  { %1242 = vmatmul.bf16.vlgmr.msra.gmra.mxu0 %v1153_v18  ;;  %1255 = vmatmul.bf16.vlgmr.msrb.gmra.mxu2 %v1153_v18 }
 0x852   :  { %1665 = vmatpush.bf16.msrb.mxu2 %v3060_v55 }
 0x856   :  { %1666 = vmatpush.bf16.msrb.mxu2 %v3066_v21 }
 0x85a   :  { %1667 = vmatpush.bf16.msrb.mxu2 %v3072_v24 }
 0x85e   :  { %1668 = vmatpush.bf16.msrb.mxu2 %v3078_v56 }
 0x8ce   :  { %v1243_v27 = vpop.f32.mrf.mxu0 }
 0x8cf   :  { %v1265_v34 = vadd.f32 %v2231_v26, %v1243_v27  ;;  %v2083_v26 = vld [vmem:[%s3231_s16 + $0x40] sm:$0xff] }
 0x8d1   :  { %v1269_v35 = vand.u32 2147483647, %v1265_v34  ;;  %v1266_v61 = vmax.f32 %v1265_v34, 0.0  ;;  %vm1267_vm14 = vcmp.ne.f32.partialorder %v1265_v34, %v1265_v34 }
 0x8d3   :  { %v1270_v31 = vsub.f32 0.0, %v1269_v35 }
 0x8d4   :  { %v1256_v9 = vpop.f32.mrf.mxu2 }
 0x8d5   :  { %v1271_v36 = vmul.f32 1.442695, %v1270_v31  ;;  %v1287_v59 = vpack.c.bf16 %v1256_v9, %v1256_v9 }
 0x8d6   :  { %v1245_v39 = vpop.f32.mrf.mxu0 }
 0x8d7   :  { %2271 = vpow2.f32 %v1271_v36  ;;  %v1295_v41 = vsel %vm309_vm5, %v1287_v59, 0  ;;  %v2085_v59 = vld [vmem:[%s3231_s16 + $0x50] sm:$0xff] }
 0x8d8   :  { %1362 = vmatpush.bf16.msra.mxu1 %v1295_v41 }
 0x8db   :  { %2071 = vmatmul.msk.bf16.vlgmr.msra.gmra.mxu1 %vm302_vm6, %v2646_v40 }
 0x8dc   :  { %v1258_v62 = vpop.f32.mrf.mxu2 }
 0x8dd   :  { %v2272_v44 = vpop.eup %2271 }
 0x8de   :  { %v1273_v3 = vadd.f32 1.0, %v2272_v44  ;;  %v1276_v32 = vmul.f32 -0.5, %v2272_v44  ;;  %v1279_v52 = vand.u32 2147483647, %v2272_v44 }
 0x8e0   :  { %2273 = vlog2.f32 %v1273_v3  ;;  %v1277_v50 = vadd.f32 1.0, %v1276_v32  ;;  %vm1280_vm12 = vcmp.lt.f32.partialorder %v1279_v52, 0.0004427343 }
 0x8e2   :  { %v1278_v60 = vmul.f32 %v2272_v44, %v1277_v50 }
 0x8e6   :  { %v2274_v53 = vpop.eup %2273 }
 0x8e7   :  { %v1275_v54 = vmul.f32 0.6931472, %v2274_v53  ;;  %v2086_v53 = vld [vmem:[%s3231_s16 + $0x58] sm:$0xff] }
 0x8e9   :  { %v1281_v42 = vsel %vm1280_vm12, %v1278_v60, %v1275_v54 }
 0x8ea   :  { %v1282_v33 = vadd.f32 %v1281_v42, %v1266_v61 }
 0x8eb   :  { %2072 = vmatmul.msk.bf16.gmra.mxu1 %vm302_vm6, %v2653_v48 }
 0x8ec   :  { %v1283_v47 = vsel %vm1267_vm14, %v1265_v34, %v1282_v33 }
 0x8ed   :  { %v1285_v51 = vpack.c.bf16 %v1283_v47, %v1283_v47  ;;  %v1284_v2 = vmul.f32 %v1283_v47, %v3053_v16 }
 0x8ef   :  { %v1289_v4 = vsel %vm309_vm5, %v1285_v51, 0  ;;  %v1286_v5 = vpack.c.bf16 %v1284_v2, %v1284_v2 }
 0x8f0   :  { %1304 = vmatpush.bf16.msrb.mxu3 %v1289_v4 }
 0x8f1   :  { %v1292_v58 = vsel %vm309_vm5, %v1286_v5, 0 }
 0x8f2   :  { %1333 = vmatpush.bf16.msrb.mxu0 %v1292_v58 }
 0x8f3   :  { %2063 = vmatmul.msk.bf16.vlgmr.msrb.gmra.mxu3 %vm302_vm6, %v2646_v40 }
 0x8f4   :  { %1443 = vmatpush.bf16.msra.mxu3 %v2704_v14 }
 0x8f5   :  { %2067 = vmatmul.msk.bf16.vlgmr.msrb.gmra.mxu0 %vm302_vm6, %v2646_v40 }
 0x8f8   :  { %1444 = vmatpush.bf16.msra.mxu3 %v2722_v20 }
 0x8fb   :  { %2073 = vmatmul.msk.bf16.gmra.mxu1 %vm302_vm6, %v2663_v1 }
 0x903   :  { %2064 = vmatmul.msk.bf16.gmra.mxu3 %vm302_vm6, %v2653_v48 }
 0x905   :  { %2068 = vmatmul.msk.bf16.gmra.mxu0 %vm302_vm6, %v2653_v48 }
 0x90b   :  { %2074 = vmatmul.msk.bf16.gmra.mxu1 %vm302_vm6, %v2674_v7 }
 0x913   :  { %2065 = vmatmul.msk.bf16.gmra.mxu3 %vm302_vm6, %v2663_v1 }
 0x915   :  { %2069 = vmatmul.msk.bf16.gmra.mxu0 %vm302_vm6, %v2663_v1 }
 0x923   :  { %2066 = vmatmul.msk.bf16.gmra.mxu3 %vm302_vm6, %v2674_v7 }
 0x925   :  { %2070 = vmatmul.msk.bf16.gmra.mxu0 %vm302_vm6, %v2674_v7 }
 0x958   :  { %v1364_v40 = vpop.f32.mrf.mxu1 }
 0x959   :  { %v1384_v20 = vmul.f32 %v1364_v40, %v2733_v22 }
 0x960   :  { %v1366_v14 = vpop.f32.mrf.mxu1 }
 0x961   :  { %v1385_v48 = vmul.f32 %v1366_v14, %v2738_v23 }
 0x963   :  { %v1392_v6 = vpack.c.bf16 %v1385_v48, %v1384_v20 }
 0x965   :  { %2075 = vmatmul.msk.bf16.vlgmr.msra.gmra.mxu2 %vm677_vm13, %v1392_v6  ;;  %2079 = vmatmul.msk.bf16.vlgmr.msra.gmra.mxu3 %vm677_vm13, %v1392_v6 }
 0x968   :  { %v1369_v17 = vpop.f32.mrf.mxu1 }
 0x969   :  { %v1386_v1 = vmul.f32 %v1369_v17, %v2747_v29 }
 0x970   :  { %v1371_v28 = vpop.f32.mrf.mxu1 }
 0x971   :  { %v1387_v43 = vmul.f32 %v1371_v28, %v2752_v30 }
 0x973   :  { %v1393_v49 = vpack.c.bf16 %v1387_v43, %v1386_v1 }
 0x975   :  { %2076 = vmatmul.msk.bf16.gmra.mxu2 %vm677_vm13, %v1393_v49  ;;  %2080 = vmatmul.msk.bf16.gmra.mxu3 %vm677_vm13, %v1393_v49 }
 0x976   :  { %v1306_v15 = vpop.f32.mrf.mxu3 }
 0x977   :  { %v1475_v34 = vmul.f32 %v2083_v26, %v1306_v15 }
 0x978   :  { %v1374_v7 = vpop.f32.mrf.mxu1 }
 0x979   :  { %v1388_v23 = vmul.f32 %v1374_v7, %v2761_v37  ;;  %v1483_v35 = vmul.f32 1.442695, %v1475_v34  ;;  %v2087_v7 = vld [vmem:[%s3231_s16 + $0x60] sm:$0xff] }
 0x97b   :  { %2275 = vpow2.f32 %v1483_v35 }
 0x97e   :  { %v1308_v37 = vpop.f32.mrf.mxu3 }
 0x980   :  { %v1376_v22 = vpop.f32.mrf.mxu1 }
 0x981   :  { %v1389_v0 = vmul.f32 %v1376_v22, %v2766_v38  ;;  %v2276_v41 = vpop.eup %2275 }
 0x982   :  { %v1507_v32 = vmul.f32 0.0, %v2276_v41 }
 0x983   :  { %v1394_v8 = vpack.c.bf16 %v1389_v0, %v1388_v23 }
 0x985   :  { %2077 = vmatmul.msk.bf16.gmra.mxu2 %vm677_vm13, %v1394_v8  ;;  %2081 = vmatmul.msk.bf16.gmra.mxu3 %vm677_vm13, %v1394_v8 }
 0x986   :  { %v1311_v12 = vpop.f32.mrf.mxu3 }
 0x987   :  { %v1477_v62 = vmul.f32 %v2085_v59, %v1311_v12  ;;  %v2090_v59 = vld [vmem:[%s3231_s16 + $0x78] sm:$0xff] }
 0x988   :  { %v1379_v10 = vpop.f32.mrf.mxu1 }
 0x989   :  { %v1390_v30 = vmul.f32 %v1379_v10, %v2775_v45  ;;  %v1335_v45 = vpop.f32.mrf.mxu0  ;;  %v1487_v52 = vmul.f32 1.442695, %v1477_v62 }
 0x98e   :  { %v1313_v38 = vpop.f32.mrf.mxu3 }
 0x98f   :  { %v1478_v47 = vmul.f32 %v2086_v53, %v1313_v38 }
 0x990   :  { %v1381_v29 = vpop.f32.mrf.mxu1 }
 0x991   :  { %v1391_v11 = vmul.f32 %v1381_v29, %v2780_v46  ;;  %v2084_v46 = vld [vmem:[%s3231_s16 + $0x48] sm:$0xff]  ;;  %v1337_v39 = vpop.f32.mrf.mxu0  ;;  %v1489_v5 = vmul.f32 1.442695, %v1478_v47 }
 0x992   :  { %v1476_v31 = vmul.f32 %v2084_v46, %v1308_v37 }
 0x993   :  { %v1395_v13 = vpack.c.bf16 %v1391_v11, %v1390_v30  ;;  %v2088_v30 = vld [vmem:[%s3231_s16 + $0x68] sm:$0xff] }
 0x994   :  { %v1485_v36 = vmul.f32 1.442695, %v1476_v31 }
 0x995   :  { %2078 = vmatmul.msk.bf16.gmra.mxu2 %vm677_vm13, %v1395_v13  ;;  %2082 = vmatmul.msk.bf16.gmra.mxu3 %vm677_vm13, %v1395_v13 }
 0x996   :  { %v1316_v63 = vpop.f32.mrf.mxu3  ;;  %2277 = vpow2.f32 %v1485_v36 }
 0x997   :  { %2279 = vpow2.f32 %v1487_v52  ;;  %v1479_v23 = vmul.f32 %v2087_v7, %v1316_v63  ;;  %v2089_v63 = vld [vmem:[%s3231_s16 + $0x70] sm:$0xff] }
 0x998   :  { %2281 = vpow2.f32 %v1489_v5  ;;  %v2219_v5 = vld [vmem:[%s3232_s18 + $0x68] sm:$0xff] }
 0x999   :  { %v1340_v42 = vpop.f32.mrf.mxu0  ;;  %v1491_v13 = vmul.f32 1.442695, %v1479_v23 }
 0x99b   :  { %2283 = vpow2.f32 %v1491_v13 }
 0x99c   :  { %v2278_v60 = vpop.eup %2277 }
 0x99d   :  { %v2280_v40 = vpop.eup %2279 }
 0x99e   :  { %v1318_v18 = vpop.f32.mrf.mxu3  ;;  %v2282_v49 = vpop.eup %2281 }
 0x99f   :  { %v1480_v12 = vmul.f32 %v2088_v30, %v1318_v18  ;;  %v2093_v30 = vmul.f32 -1.442695, %v2939_v57 }
 0x9a1   :  { %v1342_v6 = vpop.f32.mrf.mxu0  ;;  %v2284_v36 = vpop.eup %2283 }
 0x9a6   :  { %v1321_v27 = vpop.f32.mrf.mxu3 }
 0x9a7   :  { %v1481_v46 = vmul.f32 %v2089_v63, %v1321_v27 }
 0x9a9   :  { %v1345_v29 = vpop.f32.mrf.mxu0  ;;  %v1495_v18 = vmul.f32 1.442695, %v1481_v46 }
 0x9ae   :  { %v3136_v9 = vpop.f32.mrf.mxu3 }
 0x9b1   :  { %v1347_v35 = vpop.f32.mrf.mxu0 }
 0x9b9   :  { %v1350_v53 = vpop.f32.mrf.mxu0 }
 0x9e8   :  { %v1417_v44 = vpop.f32.mrf.mxu2  ;;  %v1446_v3 = vpop.f32.mrf.mxu3 }
 0x9e9   :  { %v1499_v50 = vmul.f32 %v1417_v44, %v1335_v45  ;;  %v1493_v45 = vmul.f32 1.442695, %v1480_v12  ;;  %v2232_v12 = vld [vmem:[%s3254_s5 + $0x1] ss:$0 sm:$0xff] }
 0x9eb   :  { %v1508_v54 = vadd.f32 %v1507_v32, %v1499_v50  ;;  %2285 = vpow2.f32 %v1493_v45 }
 0x9ec   :  { %2287 = vpow2.f32 %v1495_v18 }
 0x9ed   :  { %v3144_v61 = vmul.f32 %v1508_v54, %v1446_v3  ;;  %v1509_v33 = vmul.f32 %v2278_v60, %v1508_v54  ;;  %v1482_v3 = vmul.f32 %v2090_v59, %v3136_v9  ;;  %v2220_v9 = vld [vmem:[%s3232_s18 + $0x70] sm:$0xff] }
 0x9ef   :  { %v1497_v27 = vmul.f32 1.442695, %v1482_v3 }
 0x9f0   :  { %v1419_v51 = vpop.f32.mrf.mxu2  ;;  %v1448_v2 = vpop.f32.mrf.mxu3 }
 0x9f1   :  { %v1500_v4 = vmul.f32 %v1419_v51, %v1337_v39  ;;  %v2286_v50 = vpop.eup %2285  ;;  %2289 = vpow2.f32 %v1497_v27 }
 0x9f2   :  { %v2288_v47 = vpop.eup %2287  ;;  %2291 = vpow2.f32 %v2093_v30 }
 0x9f3   :  { %v1510_v58 = vadd.f32 %v1509_v33, %v1500_v4 }
 0x9f5   :  { %v3146_v14 = vmul.f32 %v1510_v58, %v1448_v2  ;;  %v1511_v20 = vmul.f32 %v2280_v40, %v1510_v58  ;;  %v1352_v40 = vpop.f32.mrf.mxu0 }
 0x9f7   :  { %v1531_v48 = vpack.c.bf16 %v3146_v14, %v3144_v61  ;;  %v2290_v58 = vpop.eup %2289  ;;  %v2215_v61 = vld [vmem:[%s3232_s18 + $0x48] sm:$0xff] }
 0x9f8   :  { %v1422_v17 = vpop.f32.mrf.mxu2  ;;  %v1451_v28 = vpop.f32.mrf.mxu3 }
 0x9f9   :  { %v1501_v1 = vmul.f32 %v1422_v17, %v1340_v42  ;;  %v2221_v42 = vld [vmem:[%s3232_s18 + $0x78] sm:$0xff] }
 0x9fa   :  { %1641 = vmatpush.bf16.msrb.mxu1 %v2221_v42 }
 0x9fb   :  { %v1512_v43 = vadd.f32 %v1511_v20, %v1501_v1 }
 0x9fd   :  { %v1513_v22 = vmul.f32 %v2282_v49, %v1512_v43  ;;  %v1525_v15 = vmul.f32 %v1512_v43, %v1451_v28  ;;  %v2218_v28 = vld [vmem:[%s3232_s18 + $0x60] sm:$0xff] }
 0x9fe   :  { %1642 = vmatpush.bf16.msrb.mxu1 %v2220_v9  ;;  %v2234_v9 = vld [vmem:[%s3235_s20] ss:$0 sm:$0xff] }
 0xa00   :  { %v1424_v0 = vpop.f32.mrf.mxu2  ;;  %v1453_v8 = vpop.f32.mrf.mxu3 }
 0xa01   :  { %v1502_v10 = vmul.f32 %v1424_v0, %v1342_v6 }
 0xa02   :  { %1643 = vmatpush.bf16.msrb.mxu1 %v2219_v5 }
 0xa03   :  { %v1514_v11 = vadd.f32 %v1513_v22, %v1502_v10  ;;  %v2217_v22 = vld [vmem:[%s3232_s18 + $0x58] sm:$0xff]  ;;  %v2216_v10 = vld [vmem:[%s3232_s18 + $0x50] sm:$0xff] }
 0xa05   :  { %v1526_v37 = vmul.f32 %v1514_v11, %v1453_v8  ;;  %v1515_v39 = vmul.f32 %v2284_v36, %v1514_v11  ;;  %v2292_v11 = vpop.eup %2291 }
 0xa06   :  { %1644 = vmatpush.bf16.msrb.mxu1 %v2218_v28  ;;  %v1557_v13 = vadd.f32 1.0, %v2292_v11 }
 0xa07   :  { %v1532_v38 = vpack.c.bf16 %v1526_v37, %v1525_v15 }
 0xa08   :  { %v1427_v26 = vpop.f32.mrf.mxu2  ;;  %v1456_v34 = vpop.f32.mrf.mxu3  ;;  %2293 = vrcp.f32 %v1557_v13  ;;  %vm1563_vm6 = vweird.f32 %v1557_v13  ;;  %v1567_v15 = vand.u32 2147483647, %v1557_v13 }
 0xa09   :  { %v1503_v31 = vmul.f32 %v1427_v26, %v1345_v29 }
 0xa0a   :  { %1645 = vmatpush.bf16.msrb.mxu1 %v2217_v22  ;;  %vm1568_vm15 = vcmp.eq.f32.partialorder %v1567_v15, 8.507059e+37 }
 0xa0b   :  { %v1516_v44 = vadd.f32 %v1515_v39, %v1503_v31 }
 0xa0d   :  { %v1517_v52 = vmul.f32 %v2286_v50, %v1516_v44  ;;  %v1527_v8 = vmul.f32 %v1516_v44, %v1456_v34  ;;  %v1540_v34 = vmul.f32 %v2232_v12, %v3053_v16 }
 0xa0e   :  { %1646 = vmatpush.bf16.msrb.mxu1 %v2216_v10 }
 0xa10   :  { %v1429_v41 = vpop.f32.mrf.mxu2  ;;  %v1458_v62 = vpop.f32.mrf.mxu3 }
 0xa11   :  { %v1504_v32 = vmul.f32 %v1429_v41, %v1347_v35 }
 0xa12   :  { %1647 = vmatpush.bf16.msrb.mxu1 %v2215_v61 }
 0xa13   :  { %v1518_v54 = vadd.f32 %v1517_v52, %v1504_v32 }
 0xa15   :  { %v1519_v2 = vmul.f32 %v2288_v47, %v1518_v54  ;;  %v1528_v23 = vmul.f32 %v1518_v54, %v1458_v62 }
 0xa17   :  { %v1533_v29 = vpack.c.bf16 %v1528_v23, %v1527_v8 }
 0xa18   :  { %v1432_v60 = vpop.f32.mrf.mxu2  ;;  %v1461_v51 = vpop.f32.mrf.mxu3 }
 0xa19   :  { %v1505_v33 = vmul.f32 %v1432_v60, %v1350_v53 }
 0xa1b   :  { %v1520_v4 = vadd.f32 %v1519_v2, %v1505_v33  ;;  %v2233_v33 = vld [vmem:[%s3234_s19] ss:$0 sm:$0xff] }
 0xa1d   :  { %v1521_v17 = vmul.f32 %v2290_v58, %v1520_v4  ;;  %v1529_v49 = vmul.f32 %v1520_v4, %v1461_v51 }
 0xa20   :  { %v1434_v20 = vpop.f32.mrf.mxu2  ;;  %v1463_v43 = vpop.f32.mrf.mxu3 }
 0xa21   :  { %v1506_v6 = vmul.f32 %v1434_v20, %v1352_v40 }
 0xa23   :  { %v1522_v1 = vadd.f32 %v1521_v17, %v1506_v6 }
 0xa25   :  { %v1530_v7 = vmul.f32 %v1522_v1, %v1463_v43 }
 0xa27   :  { %v1534_v0 = vpack.c.bf16 %v1530_v7, %v1529_v49 }
 0xa29   :  { %1545 = vmatpush.bf16.msra.mxu0 %v1534_v0 }
 0xa2d   :  { %1546 = vmatpush.bf16.msra.mxu0 %v1533_v29 }
 0xa31   :  { %1547 = vmatpush.bf16.msra.mxu0 %v1532_v38 }
 0xa35   :  { %1548 = vmatpush.bf16.msra.mxu0 %v1531_v48  ;;  %v1569_v48 = vand.u32 2147483648, %v1557_v13 }
 0xa37   :  { %v1570_v38 = vor.u32 1.1754944e-38, %v1569_v48 }
 0xa38   :  { %2092 = vmatmul.msk.bf16.vlgmr.msra.gmra.mxu0 %vm159_vm1, %v2853_v19  ;;  %v2214_v19 = vld [vmem:[%s3232_s18 + $0x40] sm:$0xff] }
 0xa39   :  { %1684 = vmatpush.bf16.msrb.mxu0 %v3060_v55  ;;  %1648 = vmatpush.bf16.msrb.mxu1 %v2214_v19  ;;  %v2294_v55 = vpop.eup %2293 }
 0xa3a   :  { %vm1564_vm5 = vweird.f32 %v2294_v55 }
 0xa3b   :  { %vm1565_vm13 = vmor %vm1563_vm6, %vm1564_vm5 }
 0xa3d   :  { %1685 = vmatpush.bf16.msrb.mxu0 %v3066_v21  ;;  %v1559_v21 = vmul.f32 %v2294_v55, %v1557_v13 }
 0xa41   :  { %1686 = vmatpush.bf16.msrb.mxu0 %v3072_v24  ;;  %v1560_v24 = vsub.f32 1.0, %v1559_v21 }
 0xa45   :  { %1687 = vmatpush.bf16.msrb.mxu0 %v3078_v56  ;;  %v1561_v56 = vmul.f32 %v2294_v55, %v1560_v24 }
 0xa47   :  { %v1562_v14 = vadd.f32 %v2294_v55, %v1561_v56 }
 0xa49   :  { %v1566_v37 = vsel %vm1565_vm13, %v2294_v55, %v1562_v14 }
 0xa4a   :  { %v1571_v26 = vsel %vm1568_vm15, %v1570_v38, %v1566_v37 }
 0xa4b   :  { %v1573_v45 = vmul.f32 %v1571_v26, %v2939_v57 }
 0xab5   :  { %v1550_v63 = vpop.f32.mrf.mxu0 }
 0xab6   :  { %v1551_v46 = vadd.f32 %v1550_v63, %v1540_v34 }
 0xab8   :  { %v1574_v35 = vmul.f32 %v1573_v45, %v1551_v46 }
 0xaba   :  { %v1592_v31 = vpack.c.bf16 %v1574_v35, %v1574_v35 }
 0xabc   :  { %1649 = vmatmul.bf16.vlgmr.msrb.gmra.mxu1 %v1592_v31 }
 0xabd   :  { %v1552_v36 = vpop.f32.mrf.mxu0 }
 0xb39   :  { %v1650_v59 = vpop.f32.mrf.mxu1 }
 0xb3a   :  { %v1654_v39 = vadd.f32 %v1650_v59, %v2874_v25 }
 0xb3c   :  { %v1657_v18 = vpack.c.bf16 %v1654_v39, %v1654_v39 }
 0xb3e   :  { %2142 = vmatmul.msk.bf16.vlgmr.msrb.gmra.mxu2 %vm159_vm1, %v1657_v18 }
 0xb41   :  { %v1652_v41 = vpop.f32.mrf.mxu1 }
 0xbc1   :  { %v1670_v62 = vpop.f32.mrf.mxu2 }
 0xbc2   :  { %v1674_v44 = vsub.f32 %v1654_v39, %v1670_v62 }
 0xbc4   :  { %v1675_v3 = vmul.f32 %v1674_v44, %v1674_v44 }
 0xbc6   :  { %v1676_v32 = vpack.c.bf16 %v1675_v3, %v1675_v3 }
 0xbc8   :  { %2143 = vmatmul.msk.bf16.vlgmr.msrb.gmra.mxu0 %vm159_vm1, %v1676_v32 }
 0xbc9   :  { %v1672_v16 = vpop.f32.mrf.mxu2 }
 0xc45   :  { %v1689_v57 = vpop.f32.mrf.mxu0 }
 0xc46   :  { %v1690_v50 = vadd.f32 1e-05, %v1689_v57 }
 0xc48   :  { %2295 = vrsqrt.f32 %v1690_v50  ;;  %vm1699_vm2 = vweird.f32 %v1690_v50 }
 0xc4d   :  { %v1691_v52 = vpop.f32.mrf.mxu0 }
 0xc4e   :  { %v2296_v27 = vpop.eup %2295 }
 0xc4f   :  { %v1694_v53 = vmul.f32 %v2296_v27, %v1690_v50  ;;  %vm1700_vm0 = vweird.f32 %v2296_v27 }
 0xc50   :  { %vm1701_vm3 = vmor %vm1699_vm2, %vm1700_vm0 }
 0xc51   :  { %v1695_v54 = vmul.f32 %v2296_v27, %v1694_v53 }
 0xc53   :  { %v1696_v60 = vmul.f32 0.5, %v1695_v54 }
 0xc55   :  { %v1697_v25 = vsub.f32 1.5, %v1696_v60 }
 0xc57   :  { %v1698_v42 = vmul.f32 %v2296_v27, %v1697_v25 }
 0xc59   :  { %v1702_v47 = vsel %vm1701_vm3, %v2296_v27, %v1698_v42 }
 0xc5a   :  { %v1703_v51 = vmul.f32 %v1702_v47, %v1674_v44 }
 0xc5c   :  { %v1707_v2 = vmul.f32 %v2233_v33, %v1703_v51 }
 0xc5e   :  { %v1711_v4 = vadd.f32 %v2234_v9, %v1707_v2 }
 0xc60   :  { %1712 = vst.msk [vmem:[%s3236_s21] sm:$0xff] %vm159_vm1, %v1711_v4 }

</bundles_post_ra>
